<compile_context>
chip_gen: v6e
topology: v6e:2x2x1
jax: 0.10.0
libtpu: 0.0.40
codegen_flags: <defaults>
</compile_context>

<pallas_src>
import jax
import jax.numpy as jnp
from jax.experimental import pallas as pl
from jax.experimental.pallas import tpu as pltpu


# ---------------------------------------------------------------------------
# Kernel
# ---------------------------------------------------------------------------
def _action_value_dis_kernel(obs_ref, w_ref, b_ref, out_ref):
    # obs_ref: (TB, D), w_ref: (D, A), b_ref: (1, A), out_ref: (TB, A)
    acc = jnp.dot(obs_ref[...], w_ref[...], preferred_element_type=jnp.float32)
    out_ref[...] = (acc + b_ref[...]).astype(out_ref.dtype)


# ---------------------------------------------------------------------------
# Parameter preparation (hoist out of the hot path; call once per param set)
# ---------------------------------------------------------------------------
def prepare_action_value_dis_params(weight, bias):
    """weight: (A, 2D) torch-Linear layout; bias: (A,).

    Returns (w1_t, b_eff):
      w1_t  : (D, A)  transposed x**1 weight block
      b_eff : (1, A)  bias with the x**0 (ones) block folded in
    """
    A, two_d = weight.shape
    D = two_d // 2
    w1_t = jnp.asarray(weight[:, D:], jnp.float32).T                      # (D, A)
    b_eff = (jnp.asarray(bias, jnp.float32)
             + jnp.asarray(weight[:, :D], jnp.float32).sum(axis=1)).reshape(1, A)
    return w1_t, b_eff


# ---------------------------------------------------------------------------
# Tiling helper
# ---------------------------------------------------------------------------
def _pick_batch_tile(B, block_b):
    # Guarantee >= 2 tiles (so both v7x TensorCores get work) while capping the
    # tile at block_b rows; tiles are sublane-aligned (multiple of 8).
    tb = min(block_b, -(-B // 2))          # ceil(B / 2), capped
    tb = max(8, ((tb + 7) // 8) * 8)
    return tb


# ---------------------------------------------------------------------------
# Forward
# ---------------------------------------------------------------------------
def action_value_dis_forward(obs, w1_t, b_eff, *, block_b=4096,
                             min_pallas_batch=1024):
    """obs: (B, D) f32; w1_t: (D, A); b_eff: (1, A).  Returns (B, A) f32."""
    B, D = obs.shape
    A = w1_t.shape[1]
    obs = obs.astype(jnp.float32)

    # Tiny batches: the whole problem is one vreg-scale op; a plain XLA dot
    # beats pallas_call + DMA fixed overhead.
    if B < min_pallas_batch:
        return obs @ w1_t + b_eff

    tb = _pick_batch_tile(B, block_b)
    num_tiles = pl.cdiv(B, tb)             # trailing partial block is masked by Pallas

    return pl.pallas_call(
        _action_value_dis_kernel,
        out_shape=jax.ShapeDtypeStruct((B, A), jnp.float32),
        grid_spec=pltpu.PrefetchScalarGridSpec(
            num_scalar_prefetch=0,
            grid=(num_tiles,),
            in_specs=[
                pl.BlockSpec((tb, D), lambda i: (i, 0)),   # obs tile (pipelined)
                pl.BlockSpec((D, A), lambda i: (0, 0)),    # weight (resident)
                pl.BlockSpec((1, A), lambda i: (0, 0)),    # folded bias (resident)
            ],
            out_specs=pl.BlockSpec((tb, A), lambda i: (i, 0)),
        ),
        compiler_params=pltpu.CompilerParams(
            dimension_semantics=("parallel",),             # batch tiles independent
        ),
    )(obs, w1_t, b_eff)


def action_value_dis(obs, weight, bias, **kw):
    """Convenience one-shot wrapper (prep + forward)."""
    w1_t, b_eff = prepare_action_value_dis_params(weight, bias)
    return action_value_dis_forward(obs, w1_t, b_eff, **kw)


# ---------------------------------------------------------------------------
# Reference (mirrors the PyTorch module exactly)
# ---------------------------------------------------------------------------
def reference_forward(obs, weight, bias):
    # make_features(obs, 2) -> [x**0 | x**1] block-wise, then Linear.
    feat = jnp.concatenate([jnp.ones_like(obs), obs], axis=-1)     # (B, 2D)
    return feat @ weight.T + bias                                   # (B, A)


if __name__ == "__main__":
    key = jax.random.PRNGKey(0)
    k_obs1, k_obs2, k_w, k_b = jax.random.split(key, 4)

    obs_dim, act_num, degree = 16, 4, 2

    # Deterministic synthetic Linear(obs_dim*degree, act_num) params.
    weight = jax.random.normal(k_w, (act_num, obs_dim * degree), dtype=jnp.float32) * 0.1
    bias = jax.random.normal(k_b, (act_num,), dtype=jnp.float32) * 0.1
    w1_t, b_eff = prepare_action_value_dis_params(weight, bias)

    # 1) Small batch consistent with the module: routes to the XLA-dot fast path.
    obs_small = jax.random.normal(k_obs1, (32, obs_dim), dtype=jnp.float32)
    out_small = jax.block_until_ready(action_value_dis_forward(obs_small, w1_t, b_eff))
    ref_small = reference_forward(obs_small, weight, bias)
    assert out_small.shape == (32, act_num), out_small.shape
    assert jnp.allclose(out_small, ref_small, atol=1e-4, rtol=1e-4)

    # 2) Larger batch: exercises the Pallas kernel (2 tiles, incl. a masked
    #    trailing partial block; "parallel" axis shards across TCs on v7x).
    B = 2504
    obs_big = jax.random.normal(k_obs2, (B, obs_dim), dtype=jnp.float32)
    out_big = jax.block_until_ready(action_value_dis_forward(obs_big, w1_t, b_eff))
    ref_big = reference_forward(obs_big, weight, bias)
    assert out_big.shape == (B, act_num), out_big.shape
    assert jnp.allclose(out_big, ref_big, atol=1e-4, rtol=1e-4)

    print("KERNEL_OK")
</pallas_src>

<mosaic_0001>
module attributes {stable_mosaic.version = 11 : i64} {
  func.func @_action_value_dis_kernel(%arg0: i32, %arg1: memref<1256x16xf32, #tpu.memory_space<vmem>>, %arg2: memref<16x4xf32, #tpu.memory_space<vmem>>, %arg3: memref<1x4xf32, #tpu.memory_space<vmem>>, %arg4: memref<1256x4xf32, #tpu.memory_space<vmem>>) attributes {dimension_semantics = [#tpu.dimension_semantics<parallel>], iteration_bounds = array<i64: 2>, scalar_prefetch = 0 : i64, scratch_operands = 0 : i64, tpu.core_type = #tpu.core_type<tc>, window_params = [{transform_indices = @transform_0, window_bounds = array<i64: 1256, 16>}, {pipeline_mode = #tpu.pipeline_mode<synchronous>, transform_indices = @transform_1, window_bounds = array<i64: 16, 4>}, {pipeline_mode = #tpu.pipeline_mode<synchronous>, transform_indices = @transform_2, window_bounds = array<i64: 1, 4>}, {transform_indices = @transform_3, window_bounds = array<i64: 1256, 4>}]} {
    %c0 = arith.constant 0 : index
    %c0_0 = arith.constant 0 : index
    %0 = vector.load %arg1[%c0, %c0_0] : memref<1256x16xf32, #tpu.memory_space<vmem>>, vector<1256x16xf32>
    %c0_1 = arith.constant 0 : index
    %c0_2 = arith.constant 0 : index
    %1 = vector.load %arg2[%c0_1, %c0_2] : memref<16x4xf32, #tpu.memory_space<vmem>>, vector<16x4xf32>
    %cst = arith.constant dense<0.000000e+00> : vector<1256x4xf32>
    %2 = tpu.matmul %0, %1, %cst {dimension_numbers = #tpu.dot_dimension_numbers<[1], [0], [0], [1], [0, 0, 1, 1], [], []>} : vector<1256x16xf32>, vector<16x4xf32>, vector<1256x4xf32> -> vector<1256x4xf32>
    %c0_3 = arith.constant 0 : index
    %c0_4 = arith.constant 0 : index
    %3 = vector.load %arg3[%c0_3, %c0_4] : memref<1x4xf32, #tpu.memory_space<vmem>>, vector<1x4xf32>
    %4 = vector.broadcast %3 : vector<1x4xf32> to vector<1256x4xf32>
    %5 = arith.addf %2, %4 : vector<1256x4xf32>
    %c0_5 = arith.constant 0 : index
    %c0_6 = arith.constant 0 : index
    %6 = vector.load %arg4[%c0_5, %c0_6] : memref<1256x4xf32, #tpu.memory_space<vmem>>, vector<1256x4xf32>
    tpu.vector_store %arg4[%c0_5, %c0_6], %5 {strides = array<i32>} : memref<1256x4xf32, #tpu.memory_space<vmem>>, vector<1256x4xf32>,
    return
  }
  func.func @transform_0(%arg0: i32) -> (i32, i32) {
    %c0_i32 = arith.constant 0 : i32
    %c0_i32_0 = arith.constant 0 : i32
    return %arg0, %c0_i32 : i32, i32
  }
  func.func @transform_1(%arg0: i32) -> (i32, i32) {
    %c0_i32 = arith.constant 0 : i32
    %c0_i32_0 = arith.constant 0 : i32
    %c0_i32_1 = arith.constant 0 : i32
    return %c0_i32, %c0_i32_0 : i32, i32
  }
  func.func @transform_2(%arg0: i32) -> (i32, i32) {
    %c0_i32 = arith.constant 0 : i32
    %c0_i32_0 = arith.constant 0 : i32
    %c0_i32_1 = arith.constant 0 : i32
    return %c0_i32, %c0_i32_0 : i32, i32
  }
  func.func @transform_3(%arg0: i32) -> (i32, i32) {
    %c0_i32 = arith.constant 0 : i32
    %c0_i32_0 = arith.constant 0 : i32
    return %arg0, %c0_i32 : i32, i32
  }
}

</mosaic_0001>

<bundles_post_ra>
// kernel: tpu_custom_call.1
= control target key start
LH: loop header
LB: loop body
LE: loop exit
PB: predicated region body
PF: predicated region fallthrough
CT: control target
= control target key end

     0   :  { %s3327_s12 = smov 0   ;;  %s3329_s13 = smov 0   ;;  %s4694_s0 = inlined_call_operand.vmem [shape: f32[2504,16], index: 0, kind: input, shape index: {}]   ;;  %s4695_s1 = inlined_call_operand.vmem [shape: f32[16,4], index: 1, kind: input, shape index: {}]   ;;  %s4696_s2 = inlined_call_operand.vmem [shape: f32[1,4], index: 2, kind: input, shape index: {}]   ;;  %s4697_s3 = inlined_call_operand.vmem [shape: f32[2504,4], index: 3, kind: output, shape index: {}]  }
   0x1   :  { %s3331_s14 = smov 0  }
   0x2 LB: > { %s3340_s15 = sadd.s32 4294967295, %s3271_s14   ;;  %s3342_s16 = sadd.s32 1, %s3271_s14   ;;  %s3271_s14 = sphi %s3331_s14, %s4706_s14   ;;  %s3267_s13 = sphi %s3329_s13, %s4705_s13   ;;  %s3263_s12 = sphi %s3327_s12, %s4704_s12  }
   0x3   : > { %s85_s17 = ssub.s32 %s3271_s14, %s3342_s16  ;;  %s88_s18 = sadd.s32 1, %s3267_s13 }
   0x4   : > { %p86_p0 = scmp.eq.s32.totalorder %s85_s17, 0  ;;  %p98_p1 = scmp.ne.s32.totalorder %s3267_s13, %s3263_s12 }
   0x5   : > { %p99_p2 = scmp.eq.s32.totalorder %s3340_s15, 1  ;;  %p2309_p3 = scmp.ge.s32.totalorder %s3271_s14, 1 }
   0x6   : > { %s3350_s19 = scalar_select %p86_p0, %s3267_s13, %s88_s18  }
   0x7   : > { %p3352_p4 = por %p99_p2, %p98_p1  ;;  %p146_p5 = scmp.lt.s32.totalorder %s3271_s14, 3 }
   0x9   : > { %p147_p6 = pnand %p2309_p3, %p146_p5 }
   0xa   : > { %s3360_s23 = smul.u32 (!%p147_p6), 157, %s3340_s15  ;;  %s170_s4 = sand.u32 (!%p147_p6), 1, %s3263_s12  }
   0xb   : > { %150 = sbr.rel (%p147_p6) target bundleno = 594 (0x252), region = 32 }
   0xc   : > { %p178_p7 = scmp.lt.s32.totalorder (!%p147_p6), %s3360_s23, 312  ;;  %s3125_s5 = smul.u32 (!%p147_p6), 1256, %s170_s4 }
   0xe   : > { %s3782_s8 = scalar_lea.vmem (!%p147_p6), [#allocation2], %s3125_s5  }
  0x10   : > { %v350_v0 = vld [vmem:[%s4695_s1 + $0x8] sm:$0xff]  ;;  %v3305_v1 = vmov 0.0   ;;  %v349_v2 = vld [vmem:[%s4695_s1] sm:$0xff]  ;;  %vm3306_vm0 = vmmov 0   ;;  %s179_s26 = scalar_select %p178_p7, %s3360_s23, 312  ;;  %vm358_vm1 = vcmask 130048  }
  0x11   : > { %2646 = vmatprep.subr.mxu0 %v3305_v1  ;;  %3121 = vmatprep.subr.mxu1 %v3305_v1  ;;  %vm1680_vm2 = vcmask 31744   ;;  %s1846_s11 = ssub.s32 (%p3352_p4), 313, %s3360_s23  ;;  %s2484_s12 = smul.u32 (%p3352_p4), 1256, %s3340_s15 }
  0x12   : > { %2647 = vmatpush3.msra.mxu0 %v350_v0  ;;  %3123 = vmatpush3.msra.mxu1 %v350_v0  ;;  %s2310_s27 = sshll.u32 %s179_s26, 3  ;;  %p1847_p8 = scmp.lt.s32.totalorder (%p3352_p4), %s1846_s11, 157 }
  0x13   : > { %2648 = vmatprep.subr.mxu0 %v3305_v1  ;;  %2650 = vmatprep.mubr.msk.f32.mxu0 %vm3306_vm0, %v3305_v1  ;;  %s3378_s30 = scalar_lea.vmem %s4694_s0, %s2310_s27  ;;  %s4495_s18 = scalar_lea.vmem (%p3352_p4), %s4697_s3, %s2484_s12  }
  0x14   : > { %2649 = vmatpush3.msra.mxu0 %v349_v2  ;;  %3122 = vmatprep.subr.mxu1 %v3305_v1  ;;  %v192_v3 = vld [vmem:[%s3378_s30] sm:$0xff]  ;;  %v271_v4 = vld [vmem:[%s3378_s30 + $0x278] sm:$0xff]  ;;  %v193_v5 = vld [vmem:[%s3378_s30 + $0x8] sm:$0xff] }
  0x15   : > { %3124 = vmatpush3.msra.mxu1 %v349_v2  ;;  %2887 = vmatprep.mubr.msk.f32.mxu1 %vm3306_vm0, %v3305_v1  ;;  %v272_v6 = vld [vmem:[%s3378_s30 + $0x280] sm:$0xff]  ;;  %v194_v7 = vld [vmem:[%s3378_s30 + $0x10] sm:$0xff]  ;;  %v273_v8 = vld [vmem:[%s3378_s30 + $0x288] sm:$0xff] }
  0x16   : > { %2651 = vmatmul.mubr.msk.f32.vlgmr.msra.gmra.mxu0 %vm358_vm1, %v192_v3  ;;  %2888 = vmatmul.mubr.msk.f32.vlgmr.msra.gmra.mxu1 %vm358_vm1, %v271_v4  ;;  %v195_v9 = vld [vmem:[%s3378_s30 + $0x18] sm:$0xff]  ;;  %v274_v10 = vld [vmem:[%s3378_s30 + $0x290] sm:$0xff]  ;;  %v196_v11 = vld [vmem:[%s3378_s30 + $0x20] sm:$0xff] }
  0x17   : > { %2653 = vmatprep.mubr.msk.f32.mxu0 %vm3306_vm0, %v3305_v1  ;;  %2890 = vmatprep.mubr.msk.f32.mxu1 %vm3306_vm0, %v3305_v1  ;;  %v275_v12 = vld [vmem:[%s3378_s30 + $0x298] sm:$0xff]  ;;  %v197_v13 = vld [vmem:[%s3378_s30 + $0x28] sm:$0xff]  ;;  %v276_v14 = vld [vmem:[%s3378_s30 + $0x2a0] sm:$0xff] }
  0x18   : > { %v198_v15 = vld [vmem:[%s3378_s30 + $0x30] sm:$0xff]  ;;  %v277_v16 = vld [vmem:[%s3378_s30 + $0x2a8] sm:$0xff]  ;;  %v199_v17 = vld [vmem:[%s3378_s30 + $0x38] sm:$0xff] }
  0x19   : > { %v278_v18 = vld [vmem:[%s3378_s30 + $0x2b0] sm:$0xff]  ;;  %v200_v19 = vld [vmem:[%s3378_s30 + $0x40] sm:$0xff]  ;;  %v279_v20 = vld [vmem:[%s3378_s30 + $0x2b8] sm:$0xff] }
  0x1a   : > { %2654 = vmatmul.mubr.msk.f32.gmra.mxu0 %vm358_vm1, %v193_v5  ;;  %2891 = vmatmul.mubr.msk.f32.gmra.mxu1 %vm358_vm1, %v272_v6  ;;  %v201_v21 = vld [vmem:[%s3378_s30 + $0x48] sm:$0xff]  ;;  %v280_v22 = vld [vmem:[%s3378_s30 + $0x2c0] sm:$0xff]  ;;  %v202_v23 = vld [vmem:[%s3378_s30 + $0x50] sm:$0xff] }
  0x1b   : > { %2656 = vmatprep.mubr.msk.f32.mxu0 %vm3306_vm0, %v3305_v1  ;;  %2893 = vmatprep.mubr.msk.f32.mxu1 %vm3306_vm0, %v3305_v1  ;;  %v281_v24 = vld [vmem:[%s3378_s30 + $0x2c8] sm:$0xff]  ;;  %v203_v25 = vld [vmem:[%s3378_s30 + $0x58] sm:$0xff]  ;;  %v282_v26 = vld [vmem:[%s3378_s30 + $0x2d0] sm:$0xff] }
  0x1c   : > { %v204_v27 = vld [vmem:[%s3378_s30 + $0x60] sm:$0xff]  ;;  %v283_v28 = vld [vmem:[%s3378_s30 + $0x2d8] sm:$0xff]  ;;  %v205_v29 = vld [vmem:[%s3378_s30 + $0x68] sm:$0xff] }
  0x1d   : > { %v284_v30 = vld [vmem:[%s3378_s30 + $0x2e0] sm:$0xff]  ;;  %v206_v31 = vld [vmem:[%s3378_s30 + $0x70] sm:$0xff]  ;;  %v285_v32 = vld [vmem:[%s3378_s30 + $0x2e8] sm:$0xff] }
  0x1e   : > { %2657 = vmatmul.mubr.msk.f32.gmra.mxu0 %vm358_vm1, %v194_v7  ;;  %2894 = vmatmul.mubr.msk.f32.gmra.mxu1 %vm358_vm1, %v273_v8  ;;  %v207_v33 = vld [vmem:[%s3378_s30 + $0x78] sm:$0xff]  ;;  %v286_v34 = vld [vmem:[%s3378_s30 + $0x2f0] sm:$0xff]  ;;  %v208_v35 = vld [vmem:[%s3378_s30 + $0x80] sm:$0xff] }
  0x1f   : > { %2659 = vmatprep.mubr.msk.f32.mxu0 %vm3306_vm0, %v3305_v1  ;;  %2896 = vmatprep.mubr.msk.f32.mxu1 %vm3306_vm0, %v3305_v1  ;;  %v287_v36 = vld [vmem:[%s3378_s30 + $0x2f8] sm:$0xff]  ;;  %v209_v37 = vld [vmem:[%s3378_s30 + $0x88] sm:$0xff]  ;;  %v288_v38 = vld [vmem:[%s3378_s30 + $0x300] sm:$0xff] }
  0x20   : > { %v210_v39 = vld [vmem:[%s3378_s30 + $0x90] sm:$0xff]  ;;  %v289_v40 = vld [vmem:[%s3378_s30 + $0x308] sm:$0xff]  ;;  %v211_v41 = vld [vmem:[%s3378_s30 + $0x98] sm:$0xff] }
  0x21   : > { %v290_v42 = vld [vmem:[%s3378_s30 + $0x310] sm:$0xff]  ;;  %v212_v43 = vld [vmem:[%s3378_s30 + $0xa0] sm:$0xff]  ;;  %v291_v44 = vld [vmem:[%s3378_s30 + $0x318] sm:$0xff] }
  0x22   : > { %2660 = vmatmul.mubr.msk.f32.gmra.mxu0 %vm358_vm1, %v195_v9  ;;  %2897 = vmatmul.mubr.msk.f32.gmra.mxu1 %vm358_vm1, %v274_v10  ;;  %v213_v45 = vld [vmem:[%s3378_s30 + $0xa8] sm:$0xff]  ;;  %v292_v46 = vld [vmem:[%s3378_s30 + $0x320] sm:$0xff]  ;;  %v214_v47 = vld [vmem:[%s3378_s30 + $0xb0] sm:$0xff] }
  0x23   : > { %2662 = vmatprep.mubr.msk.f32.mxu0 %vm3306_vm0, %v3305_v1  ;;  %2899 = vmatprep.mubr.msk.f32.mxu1 %vm3306_vm0, %v3305_v1  ;;  %v293_v48 = vld [vmem:[%s3378_s30 + $0x328] sm:$0xff]  ;;  %v215_v49 = vld [vmem:[%s3378_s30 + $0xb8] sm:$0xff]  ;;  %v294_v50 = vld [vmem:[%s3378_s30 + $0x330] sm:$0xff] }
  0x24   : > { %v216_v51 = vld [vmem:[%s3378_s30 + $0xc0] sm:$0xff]  ;;  %v295_v52 = vld [vmem:[%s3378_s30 + $0x338] sm:$0xff]  ;;  %v217_v53 = vld [vmem:[%s3378_s30 + $0xc8] sm:$0xff] }
  0x25   : > { %v296_v54 = vld [vmem:[%s3378_s30 + $0x340] sm:$0xff]  ;;  %v218_v55 = vld [vmem:[%s3378_s30 + $0xd0] sm:$0xff]  ;;  %v297_v56 = vld [vmem:[%s3378_s30 + $0x348] sm:$0xff] }
  0x26   : > { %2663 = vmatmul.mubr.msk.f32.gmra.mxu0 %vm358_vm1, %v196_v11  ;;  %2900 = vmatmul.mubr.msk.f32.gmra.mxu1 %vm358_vm1, %v275_v12  ;;  %v219_v57 = vld [vmem:[%s3378_s30 + $0xd8] sm:$0xff]  ;;  %v298_v58 = vld [vmem:[%s3378_s30 + $0x350] sm:$0xff]  ;;  %v220_v59 = vld [vmem:[%s3378_s30 + $0xe0] sm:$0xff] }
  0x27   : > { %2665 = vmatprep.mubr.msk.f32.mxu0 %vm3306_vm0, %v3305_v1  ;;  %2902 = vmatprep.mubr.msk.f32.mxu1 %vm3306_vm0, %v3305_v1  ;;  %v299_v60 = vld [vmem:[%s3378_s30 + $0x358] sm:$0xff]  ;;  %v221_v61 = vld [vmem:[%s3378_s30 + $0xe8] sm:$0xff]  ;;  %v300_v62 = vld [vmem:[%s3378_s30 + $0x360] sm:$0xff] }
  0x28   : > { %v222_v63 = vld [vmem:[%s3378_s30 + $0xf0] sm:$0xff]  ;;  %v301_v0 = vld [vmem:[%s3378_s30 + $0x368] sm:$0xff]  ;;  %v223_v2 = vld [vmem:[%s3378_s30 + $0xf8] sm:$0xff] }
  0x29   : > { %v302_v3 = vld [vmem:[%s3378_s30 + $0x370] sm:$0xff]  ;;  %v224_v4 = vld [vmem:[%s3378_s30 + $0x100] sm:$0xff]  ;;  %v303_v5 = vld [vmem:[%s3378_s30 + $0x378] sm:$0xff] }
  0x2a   : > { %2666 = vmatmul.mubr.msk.f32.gmra.mxu0 %vm358_vm1, %v197_v13  ;;  %2903 = vmatmul.mubr.msk.f32.gmra.mxu1 %vm358_vm1, %v276_v14  ;;  %v225_v6 = vld [vmem:[%s3378_s30 + $0x108] sm:$0xff]  ;;  %v304_v7 = vld [vmem:[%s3378_s30 + $0x380] sm:$0xff]  ;;  %v226_v8 = vld [vmem:[%s3378_s30 + $0x110] sm:$0xff] }
  0x2b   : > { %2668 = vmatprep.mubr.msk.f32.mxu0 %vm3306_vm0, %v3305_v1  ;;  %2905 = vmatprep.mubr.msk.f32.mxu1 %vm3306_vm0, %v3305_v1  ;;  %v305_v9 = vld [vmem:[%s3378_s30 + $0x388] sm:$0xff]  ;;  %v227_v10 = vld [vmem:[%s3378_s30 + $0x118] sm:$0xff]  ;;  %v306_v11 = vld [vmem:[%s3378_s30 + $0x390] sm:$0xff] }
  0x2c   : > { %v228_v12 = vld [vmem:[%s3378_s30 + $0x120] sm:$0xff]  ;;  %v307_v13 = vld [vmem:[%s3378_s30 + $0x398] sm:$0xff]  ;;  %v229_v14 = vld [vmem:[%s3378_s30 + $0x128] sm:$0xff] }
  0x2e   : > { %2669 = vmatmul.mubr.msk.f32.gmra.mxu0 %vm358_vm1, %v198_v15  ;;  %2906 = vmatmul.mubr.msk.f32.gmra.mxu1 %vm358_vm1, %v277_v16  ;;  %v308_v15 = vld [vmem:[%s3378_s30 + $0x3a0] sm:$0xff]  ;;  %v230_v16 = vld [vmem:[%s3378_s30 + $0x130] sm:$0xff] }
  0x2f   : > { %2671 = vmatprep.mubr.msk.f32.mxu0 %vm3306_vm0, %v3305_v1  ;;  %2908 = vmatprep.mubr.msk.f32.mxu1 %vm3306_vm0, %v3305_v1 }
  0x32   : > { %2672 = vmatmul.mubr.msk.f32.gmra.mxu0 %vm358_vm1, %v199_v17  ;;  %2909 = vmatmul.mubr.msk.f32.gmra.mxu1 %vm358_vm1, %v278_v18  ;;  %v309_v17 = vld [vmem:[%s3378_s30 + $0x3a8] sm:$0xff]  ;;  %v231_v18 = vld [vmem:[%s3378_s30 + $0x138] sm:$0xff] }
  0x33   : > { %2674 = vmatprep.mubr.msk.f32.mxu0 %vm3306_vm0, %v3305_v1  ;;  %2911 = vmatprep.mubr.msk.f32.mxu1 %vm3306_vm0, %v3305_v1 }
  0x36   : > { %2675 = vmatmul.mubr.msk.f32.gmra.mxu0 %vm358_vm1, %v200_v19  ;;  %2912 = vmatmul.mubr.msk.f32.gmra.mxu1 %vm358_vm1, %v279_v20  ;;  %v310_v19 = vld [vmem:[%s3378_s30 + $0x3b0] sm:$0xff]  ;;  %v232_v20 = vld [vmem:[%s3378_s30 + $0x140] sm:$0xff] }
  0x37   : > { %2677 = vmatprep.mubr.msk.f32.mxu0 %vm3306_vm0, %v3305_v1  ;;  %2914 = vmatprep.mubr.msk.f32.mxu1 %vm3306_vm0, %v3305_v1 }
  0x3a   : > { %2678 = vmatmul.mubr.msk.f32.gmra.mxu0 %vm358_vm1, %v201_v21  ;;  %2915 = vmatmul.mubr.msk.f32.gmra.mxu1 %vm358_vm1, %v280_v22  ;;  %v311_v21 = vld [vmem:[%s3378_s30 + $0x3b8] sm:$0xff]  ;;  %v233_v22 = vld [vmem:[%s3378_s30 + $0x148] sm:$0xff] }
  0x3b   : > { %2680 = vmatprep.mubr.msk.f32.mxu0 %vm3306_vm0, %v3305_v1  ;;  %2917 = vmatprep.mubr.msk.f32.mxu1 %vm3306_vm0, %v3305_v1 }
  0x3e   : > { %2681 = vmatmul.mubr.msk.f32.gmra.mxu0 %vm358_vm1, %v202_v23  ;;  %2918 = vmatmul.mubr.msk.f32.gmra.mxu1 %vm358_vm1, %v281_v24  ;;  %v312_v23 = vld [vmem:[%s3378_s30 + $0x3c0] sm:$0xff]  ;;  %v234_v24 = vld [vmem:[%s3378_s30 + $0x150] sm:$0xff] }
  0x3f   : > { %2683 = vmatprep.mubr.msk.f32.mxu0 %vm3306_vm0, %v3305_v1  ;;  %2920 = vmatprep.mubr.msk.f32.mxu1 %vm3306_vm0, %v3305_v1 }
  0x42   : > { %2684 = vmatmul.mubr.msk.f32.gmra.mxu0 %vm358_vm1, %v203_v25  ;;  %2921 = vmatmul.mubr.msk.f32.gmra.mxu1 %vm358_vm1, %v282_v26  ;;  %v313_v25 = vld [vmem:[%s3378_s30 + $0x3c8] sm:$0xff]  ;;  %v235_v26 = vld [vmem:[%s3378_s30 + $0x158] sm:$0xff] }
  0x43   : > { %2686 = vmatprep.mubr.msk.f32.mxu0 %vm3306_vm0, %v3305_v1  ;;  %2923 = vmatprep.mubr.msk.f32.mxu1 %vm3306_vm0, %v3305_v1 }
  0x46   : > { %2687 = vmatmul.mubr.msk.f32.gmra.mxu0 %vm358_vm1, %v204_v27  ;;  %2924 = vmatmul.mubr.msk.f32.gmra.mxu1 %vm358_vm1, %v283_v28  ;;  %v314_v27 = vld [vmem:[%s3378_s30 + $0x3d0] sm:$0xff]  ;;  %v236_v28 = vld [vmem:[%s3378_s30 + $0x160] sm:$0xff] }
  0x47   : > { %2689 = vmatprep.mubr.msk.f32.mxu0 %vm3306_vm0, %v3305_v1  ;;  %2926 = vmatprep.mubr.msk.f32.mxu1 %vm3306_vm0, %v3305_v1 }
  0x4a   : > { %2690 = vmatmul.mubr.msk.f32.gmra.mxu0 %vm358_vm1, %v205_v29  ;;  %2927 = vmatmul.mubr.msk.f32.gmra.mxu1 %vm358_vm1, %v284_v30  ;;  %v315_v29 = vld [vmem:[%s3378_s30 + $0x3d8] sm:$0xff]  ;;  %v237_v30 = vld [vmem:[%s3378_s30 + $0x168] sm:$0xff] }
  0x4b   : > { %2692 = vmatprep.mubr.msk.f32.mxu0 %vm3306_vm0, %v3305_v1  ;;  %2929 = vmatprep.mubr.msk.f32.mxu1 %vm3306_vm0, %v3305_v1 }
  0x4e   : > { %2693 = vmatmul.mubr.msk.f32.gmra.mxu0 %vm358_vm1, %v206_v31  ;;  %2930 = vmatmul.mubr.msk.f32.gmra.mxu1 %vm358_vm1, %v285_v32  ;;  %v316_v31 = vld [vmem:[%s3378_s30 + $0x3e0] sm:$0xff]  ;;  %v238_v32 = vld [vmem:[%s3378_s30 + $0x170] sm:$0xff] }
  0x4f   : > { %2695 = vmatprep.mubr.msk.f32.mxu0 %vm3306_vm0, %v3305_v1  ;;  %2932 = vmatprep.mubr.msk.f32.mxu1 %vm3306_vm0, %v3305_v1 }
  0x52   : > { %2696 = vmatmul.mubr.msk.f32.gmra.mxu0 %vm358_vm1, %v207_v33  ;;  %2933 = vmatmul.mubr.msk.f32.gmra.mxu1 %vm358_vm1, %v286_v34  ;;  %v317_v33 = vld [vmem:[%s3378_s30 + $0x3e8] sm:$0xff]  ;;  %v239_v34 = vld [vmem:[%s3378_s30 + $0x178] sm:$0xff] }
  0x53   : > { %2698 = vmatprep.mubr.msk.f32.mxu0 %vm3306_vm0, %v3305_v1  ;;  %2935 = vmatprep.mubr.msk.f32.mxu1 %vm3306_vm0, %v3305_v1 }
  0x56   : > { %2699 = vmatmul.mubr.msk.f32.gmra.mxu0 %vm358_vm1, %v208_v35  ;;  %2936 = vmatmul.mubr.msk.f32.gmra.mxu1 %vm358_vm1, %v287_v36  ;;  %v318_v35 = vld [vmem:[%s3378_s30 + $0x3f0] sm:$0xff]  ;;  %v240_v36 = vld [vmem:[%s3378_s30 + $0x180] sm:$0xff] }
  0x57   : > { %2701 = vmatprep.mubr.msk.f32.mxu0 %vm3306_vm0, %v3305_v1  ;;  %2938 = vmatprep.mubr.msk.f32.mxu1 %vm3306_vm0, %v3305_v1 }
  0x5a   : > { %2702 = vmatmul.mubr.msk.f32.gmra.mxu0 %vm358_vm1, %v209_v37  ;;  %2939 = vmatmul.mubr.msk.f32.gmra.mxu1 %vm358_vm1, %v288_v38  ;;  %v319_v37 = vld [vmem:[%s3378_s30 + $0x3f8] sm:$0xff]  ;;  %v3770_v38 = vld [vmem:[%s4696_s2] ss:$0 sm:$0xff] }
  0x5b   : > { %2704 = vmatprep.mubr.msk.f32.mxu0 %vm3306_vm0, %v3305_v1  ;;  %2941 = vmatprep.mubr.msk.f32.mxu1 %vm3306_vm0, %v3305_v1 }
  0x5e   : > { %2705 = vmatmul.mubr.msk.f32.gmra.mxu0 %vm358_vm1, %v210_v39  ;;  %2942 = vmatmul.mubr.msk.f32.gmra.mxu1 %vm358_vm1, %v289_v40 }
  0x5f   : > { %2707 = vmatprep.mubr.msk.f32.mxu0 %vm3306_vm0, %v3305_v1  ;;  %2944 = vmatprep.mubr.msk.f32.mxu1 %vm3306_vm0, %v3305_v1 }
  0x62   : > { %2708 = vmatmul.mubr.msk.f32.gmra.mxu0 %vm358_vm1, %v211_v41  ;;  %2945 = vmatmul.mubr.msk.f32.gmra.mxu1 %vm358_vm1, %v290_v42 }
  0x63   : > { %2710 = vmatprep.mubr.msk.f32.mxu0 %vm3306_vm0, %v3305_v1  ;;  %2947 = vmatprep.mubr.msk.f32.mxu1 %vm3306_vm0, %v3305_v1 }
  0x66   : > { %2711 = vmatmul.mubr.msk.f32.gmra.mxu0 %vm358_vm1, %v212_v43  ;;  %2948 = vmatmul.mubr.msk.f32.gmra.mxu1 %vm358_vm1, %v291_v44  ;;  %v241_v43 = vld [vmem:[%s3378_s30 + $0x188] sm:$0xff]  ;;  %v320_v44 = vld [vmem:[%s3378_s30 + $0x400] sm:$0xff] }
  0x67   : > { %2713 = vmatprep.mubr.msk.f32.mxu0 %vm3306_vm0, %v3305_v1  ;;  %2950 = vmatprep.mubr.msk.f32.mxu1 %vm3306_vm0, %v3305_v1 }
  0x6a   : > { %2714 = vmatmul.mubr.msk.f32.gmra.mxu0 %vm358_vm1, %v213_v45  ;;  %2951 = vmatmul.mubr.msk.f32.gmra.mxu1 %vm358_vm1, %v292_v46 }
  0x6b   : > { %2716 = vmatprep.mubr.msk.f32.mxu0 %vm3306_vm0, %v3305_v1  ;;  %2953 = vmatprep.mubr.msk.f32.mxu1 %vm3306_vm0, %v3305_v1 }
  0x6e   : > { %2717 = vmatmul.mubr.msk.f32.gmra.mxu0 %vm358_vm1, %v214_v47  ;;  %2954 = vmatmul.mubr.msk.f32.gmra.mxu1 %vm358_vm1, %v293_v48 }
  0x6f   : > { %2719 = vmatprep.mubr.msk.f32.mxu0 %vm3306_vm0, %v3305_v1  ;;  %2956 = vmatprep.mubr.msk.f32.mxu1 %vm3306_vm0, %v3305_v1 }
  0x72   : > { %2720 = vmatmul.mubr.msk.f32.gmra.mxu0 %vm358_vm1, %v215_v49  ;;  %2957 = vmatmul.mubr.msk.f32.gmra.mxu1 %vm358_vm1, %v294_v50 }
  0x73   : > { %2722 = vmatprep.mubr.msk.f32.mxu0 %vm3306_vm0, %v3305_v1  ;;  %2959 = vmatprep.mubr.msk.f32.mxu1 %vm3306_vm0, %v3305_v1 }
  0x76   : > { %2723 = vmatmul.mubr.msk.f32.gmra.mxu0 %vm358_vm1, %v216_v51  ;;  %2960 = vmatmul.mubr.msk.f32.gmra.mxu1 %vm358_vm1, %v295_v52  ;;  %v242_v51 = vld [vmem:[%s3378_s30 + $0x190] sm:$0xff]  ;;  %v321_v52 = vld [vmem:[%s3378_s30 + $0x408] sm:$0xff] }
  0x77   : > { %2725 = vmatprep.mubr.msk.f32.mxu0 %vm3306_vm0, %v3305_v1  ;;  %2962 = vmatprep.mubr.msk.f32.mxu1 %vm3306_vm0, %v3305_v1 }
  0x7a   : > { %2726 = vmatmul.mubr.msk.f32.gmra.mxu0 %vm358_vm1, %v217_v53  ;;  %2963 = vmatmul.mubr.msk.f32.gmra.mxu1 %vm358_vm1, %v296_v54 }
  0x7b   : > { %2728 = vmatprep.mubr.msk.f32.mxu0 %vm3306_vm0, %v3305_v1  ;;  %2965 = vmatprep.mubr.msk.f32.mxu1 %vm3306_vm0, %v3305_v1 }
  0x7e   : > { %2729 = vmatmul.mubr.msk.f32.gmra.mxu0 %vm358_vm1, %v218_v55  ;;  %2966 = vmatmul.mubr.msk.f32.gmra.mxu1 %vm358_vm1, %v297_v56 }
  0x7f   : > { %2731 = vmatprep.mubr.msk.f32.mxu0 %vm3306_vm0, %v3305_v1  ;;  %2968 = vmatprep.mubr.msk.f32.mxu1 %vm3306_vm0, %v3305_v1 }
  0x82   : > { %2732 = vmatmul.mubr.msk.f32.gmra.mxu0 %vm358_vm1, %v219_v57  ;;  %2969 = vmatmul.mubr.msk.f32.gmra.mxu1 %vm358_vm1, %v298_v58 }
  0x83   : > { %2734 = vmatprep.mubr.msk.f32.mxu0 %vm3306_vm0, %v3305_v1  ;;  %2971 = vmatprep.mubr.msk.f32.mxu1 %vm3306_vm0, %v3305_v1 }
  0x86   : > { %2735 = vmatmul.mubr.msk.f32.gmra.mxu0 %vm358_vm1, %v220_v59  ;;  %2972 = vmatmul.mubr.msk.f32.gmra.mxu1 %vm358_vm1, %v299_v60  ;;  %v243_v59 = vld [vmem:[%s3378_s30 + $0x198] sm:$0xff]  ;;  %v322_v60 = vld [vmem:[%s3378_s30 + $0x410] sm:$0xff] }
  0x87   : > { %2737 = vmatprep.mubr.msk.f32.mxu0 %vm3306_vm0, %v3305_v1  ;;  %2974 = vmatprep.mubr.msk.f32.mxu1 %vm3306_vm0, %v3305_v1 }
  0x8a   : > { %2738 = vmatmul.mubr.msk.f32.gmra.mxu0 %vm358_vm1, %v221_v61  ;;  %2975 = vmatmul.mubr.msk.f32.gmra.mxu1 %vm358_vm1, %v300_v62 }
  0x8b   : > { %2740 = vmatprep.mubr.msk.f32.mxu0 %vm3306_vm0, %v3305_v1  ;;  %2977 = vmatprep.mubr.msk.f32.mxu1 %vm3306_vm0, %v3305_v1 }
  0x8e   : > { %2741 = vmatmul.mubr.msk.f32.gmra.mxu0 %vm358_vm1, %v222_v63  ;;  %2978 = vmatmul.mubr.msk.f32.gmra.mxu1 %vm358_vm1, %v301_v0 }
  0x8f   : > { %2743 = vmatprep.mubr.msk.f32.mxu0 %vm3306_vm0, %v3305_v1  ;;  %2980 = vmatprep.mubr.msk.f32.mxu1 %vm3306_vm0, %v3305_v1 }
  0x92   : > { %2744 = vmatmul.mubr.msk.f32.gmra.mxu0 %vm358_vm1, %v223_v2  ;;  %2981 = vmatmul.mubr.msk.f32.gmra.mxu1 %vm358_vm1, %v302_v3 }
  0x93   : > { %2746 = vmatprep.mubr.msk.f32.mxu0 %vm3306_vm0, %v3305_v1  ;;  %2983 = vmatprep.mubr.msk.f32.mxu1 %vm3306_vm0, %v3305_v1 }
  0x96   : > { %2747 = vmatmul.mubr.msk.f32.gmra.mxu0 %vm358_vm1, %v224_v4  ;;  %2984 = vmatmul.mubr.msk.f32.gmra.mxu1 %vm358_vm1, %v303_v5  ;;  %v244_v4 = vld [vmem:[%s3378_s30 + $0x1a0] sm:$0xff]  ;;  %v323_v5 = vld [vmem:[%s3378_s30 + $0x418] sm:$0xff] }
  0x97   : > { %2749 = vmatprep.mubr.msk.f32.mxu0 %vm3306_vm0, %v3305_v1  ;;  %2986 = vmatprep.mubr.msk.f32.mxu1 %vm3306_vm0, %v3305_v1 }
  0x9a   : > { %2750 = vmatmul.mubr.msk.f32.gmra.mxu0 %vm358_vm1, %v225_v6  ;;  %2987 = vmatmul.mubr.msk.f32.gmra.mxu1 %vm358_vm1, %v304_v7 }
  0x9b   : > { %2752 = vmatprep.mubr.msk.f32.mxu0 %vm3306_vm0, %v3305_v1  ;;  %2989 = vmatprep.mubr.msk.f32.mxu1 %vm3306_vm0, %v3305_v1 }
  0x9e   : > { %2753 = vmatmul.mubr.msk.f32.gmra.mxu0 %vm358_vm1, %v226_v8  ;;  %2990 = vmatmul.mubr.msk.f32.gmra.mxu1 %vm358_vm1, %v305_v9 }
  0x9f   : > { %2755 = vmatprep.mubr.msk.f32.mxu0 %vm3306_vm0, %v3305_v1  ;;  %2992 = vmatprep.mubr.msk.f32.mxu1 %vm3306_vm0, %v3305_v1 }
  0xa2   : > { %2756 = vmatmul.mubr.msk.f32.gmra.mxu0 %vm358_vm1, %v227_v10  ;;  %2993 = vmatmul.mubr.msk.f32.gmra.mxu1 %vm358_vm1, %v306_v11 }
  0xa3   : > { %2758 = vmatprep.mubr.msk.f32.mxu0 %vm3306_vm0, %v3305_v1  ;;  %2995 = vmatprep.mubr.msk.f32.mxu1 %vm3306_vm0, %v3305_v1 }
  0xa6   : > { %2759 = vmatmul.mubr.msk.f32.gmra.mxu0 %vm358_vm1, %v228_v12  ;;  %2996 = vmatmul.mubr.msk.f32.gmra.mxu1 %vm358_vm1, %v307_v13  ;;  %v245_v12 = vld [vmem:[%s3378_s30 + $0x1a8] sm:$0xff]  ;;  %v324_v13 = vld [vmem:[%s3378_s30 + $0x420] sm:$0xff] }
  0xa7   : > { %2761 = vmatprep.mubr.msk.f32.mxu0 %vm3306_vm0, %v3305_v1  ;;  %2998 = vmatprep.mubr.msk.f32.mxu1 %vm3306_vm0, %v3305_v1 }
  0xaa   : > { %2762 = vmatmul.mubr.msk.f32.gmra.mxu0 %vm358_vm1, %v229_v14  ;;  %2999 = vmatmul.mubr.msk.f32.gmra.mxu1 %vm358_vm1, %v308_v15 }
  0xab   : > { %2764 = vmatprep.mubr.msk.f32.mxu0 %vm3306_vm0, %v3305_v1  ;;  %3001 = vmatprep.mubr.msk.f32.mxu1 %vm3306_vm0, %v3305_v1 }
  0xae   : > { %2765 = vmatmul.mubr.msk.f32.gmra.mxu0 %vm358_vm1, %v230_v16  ;;  %3002 = vmatmul.mubr.msk.f32.gmra.mxu1 %vm358_vm1, %v309_v17 }
  0xaf   : > { %2767 = vmatprep.mubr.msk.f32.mxu0 %vm3306_vm0, %v3305_v1  ;;  %3004 = vmatprep.mubr.msk.f32.mxu1 %vm3306_vm0, %v3305_v1 }
  0xb2   : > { %2768 = vmatmul.mubr.msk.f32.gmra.mxu0 %vm358_vm1, %v231_v18  ;;  %3005 = vmatmul.mubr.msk.f32.gmra.mxu1 %vm358_vm1, %v310_v19 }
  0xb3   : > { %2770 = vmatprep.mubr.msk.f32.mxu0 %vm3306_vm0, %v3305_v1  ;;  %3007 = vmatprep.mubr.msk.f32.mxu1 %vm3306_vm0, %v3305_v1 }
  0xb6   : > { %2771 = vmatmul.mubr.msk.f32.gmra.mxu0 %vm358_vm1, %v232_v20  ;;  %3008 = vmatmul.mubr.msk.f32.gmra.mxu1 %vm358_vm1, %v311_v21  ;;  %v246_v20 = vld [vmem:[%s3378_s30 + $0x1b0] sm:$0xff]  ;;  %v325_v21 = vld [vmem:[%s3378_s30 + $0x428] sm:$0xff] }
  0xb7   : > { %2773 = vmatprep.mubr.msk.f32.mxu0 %vm3306_vm0, %v3305_v1  ;;  %3010 = vmatprep.mubr.msk.f32.mxu1 %vm3306_vm0, %v3305_v1 }
  0xba   : > { %2774 = vmatmul.mubr.msk.f32.gmra.mxu0 %vm358_vm1, %v233_v22  ;;  %3011 = vmatmul.mubr.msk.f32.gmra.mxu1 %vm358_vm1, %v312_v23 }
  0xbb   : > { %2776 = vmatprep.mubr.msk.f32.mxu0 %vm3306_vm0, %v3305_v1  ;;  %3013 = vmatprep.mubr.msk.f32.mxu1 %vm3306_vm0, %v3305_v1 }
  0xbe   : > { %2777 = vmatmul.mubr.msk.f32.gmra.mxu0 %vm358_vm1, %v234_v24  ;;  %3014 = vmatmul.mubr.msk.f32.gmra.mxu1 %vm358_vm1, %v313_v25 }
  0xbf   : > { %2779 = vmatprep.mubr.msk.f32.mxu0 %vm3306_vm0, %v3305_v1  ;;  %3016 = vmatprep.mubr.msk.f32.mxu1 %vm3306_vm0, %v3305_v1 }
  0xc2   : > { %2780 = vmatmul.mubr.msk.f32.gmra.mxu0 %vm358_vm1, %v235_v26  ;;  %3017 = vmatmul.mubr.msk.f32.gmra.mxu1 %vm358_vm1, %v314_v27 }
  0xc3   : > { %2782 = vmatprep.mubr.msk.f32.mxu0 %vm3306_vm0, %v3305_v1  ;;  %3019 = vmatprep.mubr.msk.f32.mxu1 %vm3306_vm0, %v3305_v1 }
  0xc6   : > { %2783 = vmatmul.mubr.msk.f32.gmra.mxu0 %vm358_vm1, %v236_v28  ;;  %3020 = vmatmul.mubr.msk.f32.gmra.mxu1 %vm358_vm1, %v315_v29  ;;  %v247_v28 = vld [vmem:[%s3378_s30 + $0x1b8] sm:$0xff]  ;;  %v326_v29 = vld [vmem:[%s3378_s30 + $0x430] sm:$0xff] }
  0xc7   : > { %2785 = vmatprep.mubr.msk.f32.mxu0 %vm3306_vm0, %v3305_v1  ;;  %3022 = vmatprep.mubr.msk.f32.mxu1 %vm3306_vm0, %v3305_v1 }
  0xca   : > { %2786 = vmatmul.mubr.msk.f32.gmra.mxu0 %vm358_vm1, %v237_v30  ;;  %3023 = vmatmul.mubr.msk.f32.gmra.mxu1 %vm358_vm1, %v316_v31 }
  0xcb   : > { %2788 = vmatprep.mubr.msk.f32.mxu0 %vm3306_vm0, %v3305_v1  ;;  %3025 = vmatprep.mubr.msk.f32.mxu1 %vm3306_vm0, %v3305_v1 }
  0xce   : > { %2789 = vmatmul.mubr.msk.f32.gmra.mxu0 %vm358_vm1, %v238_v32  ;;  %3026 = vmatmul.mubr.msk.f32.gmra.mxu1 %vm358_vm1, %v317_v33 }
  0xcf   : > { %2791 = vmatprep.mubr.msk.f32.mxu0 %vm3306_vm0, %v3305_v1  ;;  %3028 = vmatprep.mubr.msk.f32.mxu1 %vm3306_vm0, %v3305_v1 }
  0xd2   : > { %2792 = vmatmul.mubr.msk.f32.gmra.mxu0 %vm358_vm1, %v239_v34  ;;  %3029 = vmatmul.mubr.msk.f32.gmra.mxu1 %vm358_vm1, %v318_v35 }
  0xd3   : > { %2794 = vmatprep.mubr.msk.f32.mxu0 %vm3306_vm0, %v3305_v1  ;;  %3031 = vmatprep.mubr.msk.f32.mxu1 %vm3306_vm0, %v3305_v1 }
  0xd6   : > { %v896_v39 = vpop.f32.mrf.mxu0  ;;  %2795 = vmatmul.mubr.msk.f32.gmra.mxu0 %vm358_vm1, %v240_v36  ;;  %v1291_v40 = vpop.f32.mrf.mxu1  ;;  %3032 = vmatmul.mubr.msk.f32.gmra.mxu1 %vm358_vm1, %v319_v37  ;;  %v248_v36 = vld [vmem:[%s3378_s30 + $0x1c0] sm:$0xff]  ;;  %v327_v37 = vld [vmem:[%s3378_s30 + $0x438] sm:$0xff] }
  0xd7   : > { %v897_v41 = vadd.f32 %v3770_v38, %v896_v39  ;;  %v1292_v42 = vadd.f32 %v3770_v38, %v1291_v40  ;;  %2797 = vmatprep.mubr.msk.f32.mxu0 %vm3306_vm0, %v3305_v1  ;;  %3034 = vmatprep.mubr.msk.f32.mxu1 %vm3306_vm0, %v3305_v1 }
  0xd8   : > { %v2652_v45 = vpop.f32.mrf.mxu0  ;;  %v2889_v46 = vpop.f32.mrf.mxu1 }
  0xd9   : > { %1681 = vst.msk [vmem:[%s3782_s8] sm:$0xff] %vm1680_vm2, %v897_v41  ;;  %1760 = vst.msk [vmem:[%s3782_s8 + $0x278] sm:$0xff] %vm1680_vm2, %v1292_v42  ;;  %v249_v45 = vld [vmem:[%s3378_s30 + $0x1c8] sm:$0xff]  ;;  %v328_v46 = vld [vmem:[%s3378_s30 + $0x440] sm:$0xff] }
  0xda   : > { %v901_v47 = vpop.f32.mrf.mxu0  ;;  %2798 = vmatmul.mubr.msk.f32.gmra.mxu0 %vm358_vm1, %v241_v43  ;;  %v1296_v48 = vpop.f32.mrf.mxu1  ;;  %3035 = vmatmul.mubr.msk.f32.gmra.mxu1 %vm358_vm1, %v320_v44 }
  0xdb   : > { %v902_v49 = vadd.f32 %v3770_v38, %v901_v47  ;;  %v1297_v50 = vadd.f32 %v3770_v38, %v1296_v48  ;;  %2800 = vmatprep.mubr.msk.f32.mxu0 %vm3306_vm0, %v3305_v1  ;;  %3037 = vmatprep.mubr.msk.f32.mxu1 %vm3306_vm0, %v3305_v1 }
  0xdc   : > { %v2655_v53 = vpop.f32.mrf.mxu0  ;;  %v2892_v54 = vpop.f32.mrf.mxu1 }
  0xdd   : > { %1682 = vst.msk [vmem:[%s3782_s8 + $0x8] sm:$0xff] %vm1680_vm2, %v902_v49  ;;  %1761 = vst.msk [vmem:[%s3782_s8 + $0x280] sm:$0xff] %vm1680_vm2, %v1297_v50  ;;  %v250_v53 = vld [vmem:[%s3378_s30 + $0x1d0] sm:$0xff]  ;;  %v329_v54 = vld [vmem:[%s3378_s30 + $0x448] sm:$0xff] }
  0xde   : > { %v906_v55 = vpop.f32.mrf.mxu0  ;;  %2801 = vmatmul.mubr.msk.f32.gmra.mxu0 %vm358_vm1, %v242_v51  ;;  %v1301_v56 = vpop.f32.mrf.mxu1  ;;  %3038 = vmatmul.mubr.msk.f32.gmra.mxu1 %vm358_vm1, %v321_v52 }
  0xdf   : > { %v907_v57 = vadd.f32 %v3770_v38, %v906_v55  ;;  %v1302_v58 = vadd.f32 %v3770_v38, %v1301_v56  ;;  %2803 = vmatprep.mubr.msk.f32.mxu0 %vm3306_vm0, %v3305_v1  ;;  %3040 = vmatprep.mubr.msk.f32.mxu1 %vm3306_vm0, %v3305_v1 }
  0xe0   : > { %v2658_v61 = vpop.f32.mrf.mxu0  ;;  %v2895_v62 = vpop.f32.mrf.mxu1 }
  0xe1   : > { %1683 = vst.msk [vmem:[%s3782_s8 + $0x10] sm:$0xff] %vm1680_vm2, %v907_v57  ;;  %1762 = vst.msk [vmem:[%s3782_s8 + $0x288] sm:$0xff] %vm1680_vm2, %v1302_v58  ;;  %v251_v61 = vld [vmem:[%s3378_s30 + $0x1d8] sm:$0xff]  ;;  %v330_v62 = vld [vmem:[%s3378_s30 + $0x450] sm:$0xff] }
  0xe2   : > { %v911_v63 = vpop.f32.mrf.mxu0  ;;  %2804 = vmatmul.mubr.msk.f32.gmra.mxu0 %vm358_vm1, %v243_v59  ;;  %v1306_v0 = vpop.f32.mrf.mxu1  ;;  %3041 = vmatmul.mubr.msk.f32.gmra.mxu1 %vm358_vm1, %v322_v60 }
  0xe3   : > { %v912_v2 = vadd.f32 %v3770_v38, %v911_v63  ;;  %v1307_v3 = vadd.f32 %v3770_v38, %v1306_v0  ;;  %2806 = vmatprep.mubr.msk.f32.mxu0 %vm3306_vm0, %v3305_v1  ;;  %3043 = vmatprep.mubr.msk.f32.mxu1 %vm3306_vm0, %v3305_v1 }
  0xe4   : > { %v2661_v6 = vpop.f32.mrf.mxu0  ;;  %v2898_v7 = vpop.f32.mrf.mxu1 }
  0xe5   : > { %1684 = vst.msk [vmem:[%s3782_s8 + $0x18] sm:$0xff] %vm1680_vm2, %v912_v2  ;;  %1763 = vst.msk [vmem:[%s3782_s8 + $0x290] sm:$0xff] %vm1680_vm2, %v1307_v3  ;;  %v252_v6 = vld [vmem:[%s3378_s30 + $0x1e0] sm:$0xff]  ;;  %v331_v7 = vld [vmem:[%s3378_s30 + $0x458] sm:$0xff] }
  0xe6   : > { %v916_v8 = vpop.f32.mrf.mxu0  ;;  %2807 = vmatmul.mubr.msk.f32.gmra.mxu0 %vm358_vm1, %v244_v4  ;;  %v1311_v9 = vpop.f32.mrf.mxu1  ;;  %3044 = vmatmul.mubr.msk.f32.gmra.mxu1 %vm358_vm1, %v323_v5 }
  0xe7   : > { %v917_v10 = vadd.f32 %v3770_v38, %v916_v8  ;;  %v1312_v11 = vadd.f32 %v3770_v38, %v1311_v9  ;;  %2809 = vmatprep.mubr.msk.f32.mxu0 %vm3306_vm0, %v3305_v1  ;;  %3046 = vmatprep.mubr.msk.f32.mxu1 %vm3306_vm0, %v3305_v1 }
  0xe8   : > { %v2664_v14 = vpop.f32.mrf.mxu0  ;;  %v2901_v15 = vpop.f32.mrf.mxu1 }
  0xe9   : > { %1685 = vst.msk [vmem:[%s3782_s8 + $0x20] sm:$0xff] %vm1680_vm2, %v917_v10  ;;  %1764 = vst.msk [vmem:[%s3782_s8 + $0x298] sm:$0xff] %vm1680_vm2, %v1312_v11  ;;  %v253_v14 = vld [vmem:[%s3378_s30 + $0x1e8] sm:$0xff]  ;;  %v332_v15 = vld [vmem:[%s3378_s30 + $0x460] sm:$0xff] }
  0xea   : > { %v921_v16 = vpop.f32.mrf.mxu0  ;;  %2810 = vmatmul.mubr.msk.f32.gmra.mxu0 %vm358_vm1, %v245_v12  ;;  %v1316_v17 = vpop.f32.mrf.mxu1  ;;  %3047 = vmatmul.mubr.msk.f32.gmra.mxu1 %vm358_vm1, %v324_v13 }
  0xeb   : > { %v922_v18 = vadd.f32 %v3770_v38, %v921_v16  ;;  %v1317_v19 = vadd.f32 %v3770_v38, %v1316_v17  ;;  %2812 = vmatprep.mubr.msk.f32.mxu0 %vm3306_vm0, %v3305_v1  ;;  %3049 = vmatprep.mubr.msk.f32.mxu1 %vm3306_vm0, %v3305_v1 }
  0xec   : > { %v2667_v22 = vpop.f32.mrf.mxu0  ;;  %v2904_v23 = vpop.f32.mrf.mxu1 }
  0xed   : > { %1686 = vst.msk [vmem:[%s3782_s8 + $0x28] sm:$0xff] %vm1680_vm2, %v922_v18  ;;  %1765 = vst.msk [vmem:[%s3782_s8 + $0x2a0] sm:$0xff] %vm1680_vm2, %v1317_v19  ;;  %v254_v22 = vld [vmem:[%s3378_s30 + $0x1f0] sm:$0xff]  ;;  %v333_v23 = vld [vmem:[%s3378_s30 + $0x468] sm:$0xff] }
  0xee   : > { %v926_v24 = vpop.f32.mrf.mxu0  ;;  %2813 = vmatmul.mubr.msk.f32.gmra.mxu0 %vm358_vm1, %v246_v20  ;;  %v1321_v25 = vpop.f32.mrf.mxu1  ;;  %3050 = vmatmul.mubr.msk.f32.gmra.mxu1 %vm358_vm1, %v325_v21 }
  0xef   : > { %v927_v26 = vadd.f32 %v3770_v38, %v926_v24  ;;  %v1322_v27 = vadd.f32 %v3770_v38, %v1321_v25  ;;  %2815 = vmatprep.mubr.msk.f32.mxu0 %vm3306_vm0, %v3305_v1  ;;  %3052 = vmatprep.mubr.msk.f32.mxu1 %vm3306_vm0, %v3305_v1 }
  0xf0   : > { %v2670_v30 = vpop.f32.mrf.mxu0  ;;  %v2907_v31 = vpop.f32.mrf.mxu1 }
  0xf1   : > { %1687 = vst.msk [vmem:[%s3782_s8 + $0x30] sm:$0xff] %vm1680_vm2, %v927_v26  ;;  %1766 = vst.msk [vmem:[%s3782_s8 + $0x2a8] sm:$0xff] %vm1680_vm2, %v1322_v27  ;;  %v255_v30 = vld [vmem:[%s3378_s30 + $0x1f8] sm:$0xff]  ;;  %v334_v31 = vld [vmem:[%s3378_s30 + $0x470] sm:$0xff] }
  0xf2   : > { %v931_v32 = vpop.f32.mrf.mxu0  ;;  %2816 = vmatmul.mubr.msk.f32.gmra.mxu0 %vm358_vm1, %v247_v28  ;;  %v1326_v33 = vpop.f32.mrf.mxu1  ;;  %3053 = vmatmul.mubr.msk.f32.gmra.mxu1 %vm358_vm1, %v326_v29 }
  0xf3   : > { %v932_v34 = vadd.f32 %v3770_v38, %v931_v32  ;;  %v1327_v35 = vadd.f32 %v3770_v38, %v1326_v33  ;;  %2818 = vmatprep.mubr.msk.f32.mxu0 %vm3306_vm0, %v3305_v1  ;;  %3055 = vmatprep.mubr.msk.f32.mxu1 %vm3306_vm0, %v3305_v1 }
  0xf4   : > { %v2673_v39 = vpop.f32.mrf.mxu0  ;;  %v2910_v40 = vpop.f32.mrf.mxu1 }
  0xf5   : > { %1688 = vst.msk [vmem:[%s3782_s8 + $0x38] sm:$0xff] %vm1680_vm2, %v932_v34  ;;  %1767 = vst.msk [vmem:[%s3782_s8 + $0x2b0] sm:$0xff] %vm1680_vm2, %v1327_v35  ;;  %v256_v39 = vld [vmem:[%s3378_s30 + $0x200] sm:$0xff]  ;;  %v335_v40 = vld [vmem:[%s3378_s30 + $0x478] sm:$0xff] }
  0xf6   : > { %v936_v41 = vpop.f32.mrf.mxu0  ;;  %2819 = vmatmul.mubr.msk.f32.gmra.mxu0 %vm358_vm1, %v248_v36  ;;  %v1331_v42 = vpop.f32.mrf.mxu1  ;;  %3056 = vmatmul.mubr.msk.f32.gmra.mxu1 %vm358_vm1, %v327_v37 }
  0xf7   : > { %v937_v43 = vadd.f32 %v3770_v38, %v936_v41  ;;  %v1332_v44 = vadd.f32 %v3770_v38, %v1331_v42  ;;  %2821 = vmatprep.mubr.msk.f32.mxu0 %vm3306_vm0, %v3305_v1  ;;  %3058 = vmatprep.mubr.msk.f32.mxu1 %vm3306_vm0, %v3305_v1 }
  0xf8   : > { %v2676_v47 = vpop.f32.mrf.mxu0  ;;  %v2913_v48 = vpop.f32.mrf.mxu1 }
  0xf9   : > { %1689 = vst.msk [vmem:[%s3782_s8 + $0x40] sm:$0xff] %vm1680_vm2, %v937_v43  ;;  %1768 = vst.msk [vmem:[%s3782_s8 + $0x2b8] sm:$0xff] %vm1680_vm2, %v1332_v44  ;;  %v257_v47 = vld [vmem:[%s3378_s30 + $0x208] sm:$0xff]  ;;  %v336_v48 = vld [vmem:[%s3378_s30 + $0x480] sm:$0xff] }
  0xfa   : > { %v941_v49 = vpop.f32.mrf.mxu0  ;;  %2822 = vmatmul.mubr.msk.f32.gmra.mxu0 %vm358_vm1, %v249_v45  ;;  %v1336_v50 = vpop.f32.mrf.mxu1  ;;  %3059 = vmatmul.mubr.msk.f32.gmra.mxu1 %vm358_vm1, %v328_v46 }
  0xfb   : > { %v942_v51 = vadd.f32 %v3770_v38, %v941_v49  ;;  %v1337_v52 = vadd.f32 %v3770_v38, %v1336_v50  ;;  %2824 = vmatprep.mubr.msk.f32.mxu0 %vm3306_vm0, %v3305_v1  ;;  %3061 = vmatprep.mubr.msk.f32.mxu1 %vm3306_vm0, %v3305_v1 }
  0xfc   : > { %v2679_v55 = vpop.f32.mrf.mxu0  ;;  %v2916_v56 = vpop.f32.mrf.mxu1 }
  0xfd   : > { %1690 = vst.msk [vmem:[%s3782_s8 + $0x48] sm:$0xff] %vm1680_vm2, %v942_v51  ;;  %1769 = vst.msk [vmem:[%s3782_s8 + $0x2c0] sm:$0xff] %vm1680_vm2, %v1337_v52  ;;  %v258_v55 = vld [vmem:[%s3378_s30 + $0x210] sm:$0xff]  ;;  %v337_v56 = vld [vmem:[%s3378_s30 + $0x488] sm:$0xff] }
  0xfe   : > { %v946_v57 = vpop.f32.mrf.mxu0  ;;  %2825 = vmatmul.mubr.msk.f32.gmra.mxu0 %vm358_vm1, %v250_v53  ;;  %v1341_v58 = vpop.f32.mrf.mxu1  ;;  %3062 = vmatmul.mubr.msk.f32.gmra.mxu1 %vm358_vm1, %v329_v54 }
  0xff   : > { %v947_v59 = vadd.f32 %v3770_v38, %v946_v57  ;;  %v1342_v60 = vadd.f32 %v3770_v38, %v1341_v58  ;;  %2827 = vmatprep.mubr.msk.f32.mxu0 %vm3306_vm0, %v3305_v1  ;;  %3064 = vmatprep.mubr.msk.f32.mxu1 %vm3306_vm0, %v3305_v1 }
 0x100   : > { %v2682_v63 = vpop.f32.mrf.mxu0  ;;  %v2919_v0 = vpop.f32.mrf.mxu1 }
 0x101   : > { %1691 = vst.msk [vmem:[%s3782_s8 + $0x50] sm:$0xff] %vm1680_vm2, %v947_v59  ;;  %1770 = vst.msk [vmem:[%s3782_s8 + $0x2c8] sm:$0xff] %vm1680_vm2, %v1342_v60  ;;  %v259_v63 = vld [vmem:[%s3378_s30 + $0x218] sm:$0xff]  ;;  %v338_v0 = vld [vmem:[%s3378_s30 + $0x490] sm:$0xff] }
 0x102   : > { %v951_v2 = vpop.f32.mrf.mxu0  ;;  %2828 = vmatmul.mubr.msk.f32.gmra.mxu0 %vm358_vm1, %v251_v61  ;;  %v1346_v3 = vpop.f32.mrf.mxu1  ;;  %3065 = vmatmul.mubr.msk.f32.gmra.mxu1 %vm358_vm1, %v330_v62 }
 0x103   : > { %v952_v4 = vadd.f32 %v3770_v38, %v951_v2  ;;  %v1347_v5 = vadd.f32 %v3770_v38, %v1346_v3  ;;  %2830 = vmatprep.mubr.msk.f32.mxu0 %vm3306_vm0, %v3305_v1  ;;  %3067 = vmatprep.mubr.msk.f32.mxu1 %vm3306_vm0, %v3305_v1 }
 0x104   : > { %v2685_v8 = vpop.f32.mrf.mxu0  ;;  %v2922_v9 = vpop.f32.mrf.mxu1 }
 0x105   : > { %1692 = vst.msk [vmem:[%s3782_s8 + $0x58] sm:$0xff] %vm1680_vm2, %v952_v4  ;;  %1771 = vst.msk [vmem:[%s3782_s8 + $0x2d0] sm:$0xff] %vm1680_vm2, %v1347_v5  ;;  %v260_v8 = vld [vmem:[%s3378_s30 + $0x220] sm:$0xff]  ;;  %v339_v9 = vld [vmem:[%s3378_s30 + $0x498] sm:$0xff] }
 0x106   : > { %v956_v10 = vpop.f32.mrf.mxu0  ;;  %2831 = vmatmul.mubr.msk.f32.gmra.mxu0 %vm358_vm1, %v252_v6  ;;  %v1351_v11 = vpop.f32.mrf.mxu1  ;;  %3068 = vmatmul.mubr.msk.f32.gmra.mxu1 %vm358_vm1, %v331_v7 }
 0x107   : > { %v957_v12 = vadd.f32 %v3770_v38, %v956_v10  ;;  %v1352_v13 = vadd.f32 %v3770_v38, %v1351_v11  ;;  %2833 = vmatprep.mubr.msk.f32.mxu0 %vm3306_vm0, %v3305_v1  ;;  %3070 = vmatprep.mubr.msk.f32.mxu1 %vm3306_vm0, %v3305_v1 }
 0x108   : > { %v2688_v16 = vpop.f32.mrf.mxu0  ;;  %v2925_v17 = vpop.f32.mrf.mxu1 }
 0x109   : > { %1693 = vst.msk [vmem:[%s3782_s8 + $0x60] sm:$0xff] %vm1680_vm2, %v957_v12  ;;  %1772 = vst.msk [vmem:[%s3782_s8 + $0x2d8] sm:$0xff] %vm1680_vm2, %v1352_v13  ;;  %v261_v16 = vld [vmem:[%s3378_s30 + $0x228] sm:$0xff]  ;;  %v340_v17 = vld [vmem:[%s3378_s30 + $0x4a0] sm:$0xff] }
 0x10a   : > { %v961_v18 = vpop.f32.mrf.mxu0  ;;  %2834 = vmatmul.mubr.msk.f32.gmra.mxu0 %vm358_vm1, %v253_v14  ;;  %v1356_v19 = vpop.f32.mrf.mxu1  ;;  %3071 = vmatmul.mubr.msk.f32.gmra.mxu1 %vm358_vm1, %v332_v15 }
 0x10b   : > { %v962_v20 = vadd.f32 %v3770_v38, %v961_v18  ;;  %v1357_v21 = vadd.f32 %v3770_v38, %v1356_v19  ;;  %2836 = vmatprep.mubr.msk.f32.mxu0 %vm3306_vm0, %v3305_v1  ;;  %3073 = vmatprep.mubr.msk.f32.mxu1 %vm3306_vm0, %v3305_v1 }
 0x10c   : > { %v2691_v24 = vpop.f32.mrf.mxu0  ;;  %v2928_v25 = vpop.f32.mrf.mxu1 }
 0x10d   : > { %1694 = vst.msk [vmem:[%s3782_s8 + $0x68] sm:$0xff] %vm1680_vm2, %v962_v20  ;;  %1773 = vst.msk [vmem:[%s3782_s8 + $0x2e0] sm:$0xff] %vm1680_vm2, %v1357_v21  ;;  %v262_v24 = vld [vmem:[%s3378_s30 + $0x230] sm:$0xff]  ;;  %v341_v25 = vld [vmem:[%s3378_s30 + $0x4a8] sm:$0xff] }
 0x10e   : > { %v966_v26 = vpop.f32.mrf.mxu0  ;;  %2837 = vmatmul.mubr.msk.f32.gmra.mxu0 %vm358_vm1, %v254_v22  ;;  %v1361_v27 = vpop.f32.mrf.mxu1  ;;  %3074 = vmatmul.mubr.msk.f32.gmra.mxu1 %vm358_vm1, %v333_v23 }
 0x10f   : > { %v967_v28 = vadd.f32 %v3770_v38, %v966_v26  ;;  %v1362_v29 = vadd.f32 %v3770_v38, %v1361_v27  ;;  %2839 = vmatprep.mubr.msk.f32.mxu0 %vm3306_vm0, %v3305_v1  ;;  %3076 = vmatprep.mubr.msk.f32.mxu1 %vm3306_vm0, %v3305_v1 }
 0x110   : > { %v2694_v32 = vpop.f32.mrf.mxu0  ;;  %v2931_v33 = vpop.f32.mrf.mxu1 }
 0x111   : > { %1695 = vst.msk [vmem:[%s3782_s8 + $0x70] sm:$0xff] %vm1680_vm2, %v967_v28  ;;  %1774 = vst.msk [vmem:[%s3782_s8 + $0x2e8] sm:$0xff] %vm1680_vm2, %v1362_v29  ;;  %v263_v32 = vld [vmem:[%s3378_s30 + $0x238] sm:$0xff]  ;;  %v342_v33 = vld [vmem:[%s3378_s30 + $0x4b0] sm:$0xff] }
 0x112   : > { %v971_v34 = vpop.f32.mrf.mxu0  ;;  %2840 = vmatmul.mubr.msk.f32.gmra.mxu0 %vm358_vm1, %v255_v30  ;;  %v1366_v35 = vpop.f32.mrf.mxu1  ;;  %3077 = vmatmul.mubr.msk.f32.gmra.mxu1 %vm358_vm1, %v334_v31 }
 0x113   : > { %v972_v36 = vadd.f32 %v3770_v38, %v971_v34  ;;  %v1367_v37 = vadd.f32 %v3770_v38, %v1366_v35  ;;  %2842 = vmatprep.mubr.msk.f32.mxu0 %vm3306_vm0, %v3305_v1  ;;  %3079 = vmatprep.mubr.msk.f32.mxu1 %vm3306_vm0, %v3305_v1 }
 0x114   : > { %v2697_v41 = vpop.f32.mrf.mxu0  ;;  %v2934_v42 = vpop.f32.mrf.mxu1 }
 0x115   : > { %1696 = vst.msk [vmem:[%s3782_s8 + $0x78] sm:$0xff] %vm1680_vm2, %v972_v36  ;;  %1775 = vst.msk [vmem:[%s3782_s8 + $0x2f0] sm:$0xff] %vm1680_vm2, %v1367_v37  ;;  %v264_v41 = vld [vmem:[%s3378_s30 + $0x240] sm:$0xff]  ;;  %v343_v42 = vld [vmem:[%s3378_s30 + $0x4b8] sm:$0xff] }
 0x116   : > { %v976_v43 = vpop.f32.mrf.mxu0  ;;  %2843 = vmatmul.mubr.msk.f32.gmra.mxu0 %vm358_vm1, %v256_v39  ;;  %v1371_v44 = vpop.f32.mrf.mxu1  ;;  %3080 = vmatmul.mubr.msk.f32.gmra.mxu1 %vm358_vm1, %v335_v40 }
 0x117   : > { %v977_v45 = vadd.f32 %v3770_v38, %v976_v43  ;;  %v1372_v46 = vadd.f32 %v3770_v38, %v1371_v44  ;;  %2845 = vmatprep.mubr.msk.f32.mxu0 %vm3306_vm0, %v3305_v1  ;;  %3082 = vmatprep.mubr.msk.f32.mxu1 %vm3306_vm0, %v3305_v1 }
 0x118   : > { %v2700_v49 = vpop.f32.mrf.mxu0  ;;  %v2937_v50 = vpop.f32.mrf.mxu1 }
 0x119   : > { %1697 = vst.msk [vmem:[%s3782_s8 + $0x80] sm:$0xff] %vm1680_vm2, %v977_v45  ;;  %1776 = vst.msk [vmem:[%s3782_s8 + $0x2f8] sm:$0xff] %vm1680_vm2, %v1372_v46  ;;  %v265_v49 = vld [vmem:[%s3378_s30 + $0x248] sm:$0xff]  ;;  %v344_v50 = vld [vmem:[%s3378_s30 + $0x4c0] sm:$0xff] }
 0x11a   : > { %v981_v51 = vpop.f32.mrf.mxu0  ;;  %2846 = vmatmul.mubr.msk.f32.gmra.mxu0 %vm358_vm1, %v257_v47  ;;  %v1376_v52 = vpop.f32.mrf.mxu1  ;;  %3083 = vmatmul.mubr.msk.f32.gmra.mxu1 %vm358_vm1, %v336_v48 }
 0x11b   : > { %v982_v53 = vadd.f32 %v3770_v38, %v981_v51  ;;  %v1377_v54 = vadd.f32 %v3770_v38, %v1376_v52  ;;  %2848 = vmatprep.mubr.msk.f32.mxu0 %vm3306_vm0, %v3305_v1  ;;  %3085 = vmatprep.mubr.msk.f32.mxu1 %vm3306_vm0, %v3305_v1 }
 0x11c   : > { %v2703_v57 = vpop.f32.mrf.mxu0  ;;  %v2940_v58 = vpop.f32.mrf.mxu1 }
 0x11d   : > { %1698 = vst.msk [vmem:[%s3782_s8 + $0x88] sm:$0xff] %vm1680_vm2, %v982_v53  ;;  %1777 = vst.msk [vmem:[%s3782_s8 + $0x300] sm:$0xff] %vm1680_vm2, %v1377_v54  ;;  %v266_v57 = vld [vmem:[%s3378_s30 + $0x250] sm:$0xff]  ;;  %v345_v58 = vld [vmem:[%s3378_s30 + $0x4c8] sm:$0xff] }
 0x11e   : > { %v986_v59 = vpop.f32.mrf.mxu0  ;;  %2849 = vmatmul.mubr.msk.f32.gmra.mxu0 %vm358_vm1, %v258_v55  ;;  %v1381_v60 = vpop.f32.mrf.mxu1  ;;  %3086 = vmatmul.mubr.msk.f32.gmra.mxu1 %vm358_vm1, %v337_v56 }
 0x11f   : > { %v987_v61 = vadd.f32 %v3770_v38, %v986_v59  ;;  %v1382_v62 = vadd.f32 %v3770_v38, %v1381_v60  ;;  %2851 = vmatprep.mubr.msk.f32.mxu0 %vm3306_vm0, %v3305_v1  ;;  %3088 = vmatprep.mubr.msk.f32.mxu1 %vm3306_vm0, %v3305_v1 }
 0x120   : > { %v2706_v2 = vpop.f32.mrf.mxu0  ;;  %v2943_v3 = vpop.f32.mrf.mxu1 }
 0x121   : > { %1699 = vst.msk [vmem:[%s3782_s8 + $0x90] sm:$0xff] %vm1680_vm2, %v987_v61  ;;  %1778 = vst.msk [vmem:[%s3782_s8 + $0x308] sm:$0xff] %vm1680_vm2, %v1382_v62  ;;  %v267_v2 = vld [vmem:[%s3378_s30 + $0x258] sm:$0xff]  ;;  %v346_v3 = vld [vmem:[%s3378_s30 + $0x4d0] sm:$0xff] }
 0x122   : > { %v991_v4 = vpop.f32.mrf.mxu0  ;;  %2852 = vmatmul.mubr.msk.f32.gmra.mxu0 %vm358_vm1, %v259_v63  ;;  %v1386_v5 = vpop.f32.mrf.mxu1  ;;  %3089 = vmatmul.mubr.msk.f32.gmra.mxu1 %vm358_vm1, %v338_v0 }
 0x123   : > { %v992_v6 = vadd.f32 %v3770_v38, %v991_v4  ;;  %v1387_v7 = vadd.f32 %v3770_v38, %v1386_v5  ;;  %2854 = vmatprep.mubr.msk.f32.mxu0 %vm3306_vm0, %v3305_v1  ;;  %3091 = vmatprep.mubr.msk.f32.mxu1 %vm3306_vm0, %v3305_v1 }
 0x124   : > { %v2709_v10 = vpop.f32.mrf.mxu0  ;;  %v2946_v11 = vpop.f32.mrf.mxu1 }
 0x125   : > { %1700 = vst.msk [vmem:[%s3782_s8 + $0x98] sm:$0xff] %vm1680_vm2, %v992_v6  ;;  %1779 = vst.msk [vmem:[%s3782_s8 + $0x310] sm:$0xff] %vm1680_vm2, %v1387_v7  ;;  %v268_v10 = vld [vmem:[%s3378_s30 + $0x260] sm:$0xff]  ;;  %v347_v11 = vld [vmem:[%s3378_s30 + $0x4d8] sm:$0xff] }
 0x126   : > { %v996_v12 = vpop.f32.mrf.mxu0  ;;  %2855 = vmatmul.mubr.msk.f32.gmra.mxu0 %vm358_vm1, %v260_v8  ;;  %v1391_v13 = vpop.f32.mrf.mxu1  ;;  %3092 = vmatmul.mubr.msk.f32.gmra.mxu1 %vm358_vm1, %v339_v9 }
 0x127   : > { %v997_v14 = vadd.f32 %v3770_v38, %v996_v12  ;;  %v1392_v15 = vadd.f32 %v3770_v38, %v1391_v13  ;;  %2857 = vmatprep.mubr.msk.f32.mxu0 %vm3306_vm0, %v3305_v1  ;;  %3094 = vmatprep.mubr.msk.f32.mxu1 %vm3306_vm0, %v3305_v1 }
 0x128   : > { %v2712_v18 = vpop.f32.mrf.mxu0  ;;  %v2949_v19 = vpop.f32.mrf.mxu1 }
 0x129   : > { %1701 = vst.msk [vmem:[%s3782_s8 + $0xa0] sm:$0xff] %vm1680_vm2, %v997_v14  ;;  %1780 = vst.msk [vmem:[%s3782_s8 + $0x318] sm:$0xff] %vm1680_vm2, %v1392_v15  ;;  %v269_v18 = vld [vmem:[%s3378_s30 + $0x268] sm:$0xff]  ;;  %v348_v19 = vld [vmem:[%s3378_s30 + $0x4e0] sm:$0xff] }
 0x12a   : > { %v1001_v20 = vpop.f32.mrf.mxu0  ;;  %2858 = vmatmul.mubr.msk.f32.gmra.mxu0 %vm358_vm1, %v261_v16  ;;  %v1396_v21 = vpop.f32.mrf.mxu1  ;;  %3095 = vmatmul.mubr.msk.f32.gmra.mxu1 %vm358_vm1, %v340_v17 }
 0x12b   : > { %v1002_v22 = vadd.f32 %v3770_v38, %v1001_v20  ;;  %v1397_v23 = vadd.f32 %v3770_v38, %v1396_v21  ;;  %2860 = vmatprep.mubr.msk.f32.mxu0 %vm3306_vm0, %v3305_v1  ;;  %3097 = vmatprep.mubr.msk.f32.mxu1 %vm3306_vm0, %v3305_v1 }
 0x12c   : > { %v2715_v26 = vpop.f32.mrf.mxu0  ;;  %v2952_v27 = vpop.f32.mrf.mxu1 }
 0x12d   : > { %1702 = vst.msk [vmem:[%s3782_s8 + $0xa8] sm:$0xff] %vm1680_vm2, %v1002_v22  ;;  %1781 = vst.msk [vmem:[%s3782_s8 + $0x320] sm:$0xff] %vm1680_vm2, %v1397_v23  ;;  %v270_v26 = vld [vmem:[%s3378_s30 + $0x270] sm:$0xff] }
 0x12e   : > { %v1006_v28 = vpop.f32.mrf.mxu0  ;;  %2861 = vmatmul.mubr.msk.f32.gmra.mxu0 %vm358_vm1, %v262_v24  ;;  %v1401_v29 = vpop.f32.mrf.mxu1  ;;  %3098 = vmatmul.mubr.msk.f32.gmra.mxu1 %vm358_vm1, %v341_v25 }
 0x12f   : > { %v1007_v30 = vadd.f32 %v3770_v38, %v1006_v28  ;;  %v1402_v31 = vadd.f32 %v3770_v38, %v1401_v29  ;;  %2863 = vmatprep.mubr.msk.f32.mxu0 %vm3306_vm0, %v3305_v1  ;;  %3100 = vmatprep.mubr.msk.f32.mxu1 %vm3306_vm0, %v3305_v1 }
 0x130   : > { %v2718_v34 = vpop.f32.mrf.mxu0  ;;  %v2955_v35 = vpop.f32.mrf.mxu1 }
 0x131   : > { %1703 = vst.msk [vmem:[%s3782_s8 + $0xb0] sm:$0xff] %vm1680_vm2, %v1007_v30  ;;  %1782 = vst.msk [vmem:[%s3782_s8 + $0x328] sm:$0xff] %vm1680_vm2, %v1402_v31 }
 0x132   : > { %v1011_v36 = vpop.f32.mrf.mxu0  ;;  %2864 = vmatmul.mubr.msk.f32.gmra.mxu0 %vm358_vm1, %v263_v32  ;;  %v1406_v37 = vpop.f32.mrf.mxu1  ;;  %3101 = vmatmul.mubr.msk.f32.gmra.mxu1 %vm358_vm1, %v342_v33 }
 0x133   : > { %v1012_v39 = vadd.f32 %v3770_v38, %v1011_v36  ;;  %v1407_v40 = vadd.f32 %v3770_v38, %v1406_v37  ;;  %2866 = vmatprep.mubr.msk.f32.mxu0 %vm3306_vm0, %v3305_v1  ;;  %3103 = vmatprep.mubr.msk.f32.mxu1 %vm3306_vm0, %v3305_v1 }
 0x134   : > { %v2721_v43 = vpop.f32.mrf.mxu0  ;;  %v2958_v44 = vpop.f32.mrf.mxu1 }
 0x135   : > { %1704 = vst.msk [vmem:[%s3782_s8 + $0xb8] sm:$0xff] %vm1680_vm2, %v1012_v39  ;;  %1783 = vst.msk [vmem:[%s3782_s8 + $0x330] sm:$0xff] %vm1680_vm2, %v1407_v40 }
 0x136   : > { %v1016_v45 = vpop.f32.mrf.mxu0  ;;  %2867 = vmatmul.mubr.msk.f32.gmra.mxu0 %vm358_vm1, %v264_v41  ;;  %v1411_v46 = vpop.f32.mrf.mxu1  ;;  %3104 = vmatmul.mubr.msk.f32.gmra.mxu1 %vm358_vm1, %v343_v42 }
 0x137   : > { %v1017_v47 = vadd.f32 %v3770_v38, %v1016_v45  ;;  %v1412_v48 = vadd.f32 %v3770_v38, %v1411_v46  ;;  %2869 = vmatprep.mubr.msk.f32.mxu0 %vm3306_vm0, %v3305_v1  ;;  %3106 = vmatprep.mubr.msk.f32.mxu1 %vm3306_vm0, %v3305_v1 }
 0x138   : > { %v2724_v51 = vpop.f32.mrf.mxu0  ;;  %v2961_v52 = vpop.f32.mrf.mxu1 }
 0x139   : > { %1705 = vst.msk [vmem:[%s3782_s8 + $0xc0] sm:$0xff] %vm1680_vm2, %v1017_v47  ;;  %1784 = vst.msk [vmem:[%s3782_s8 + $0x338] sm:$0xff] %vm1680_vm2, %v1412_v48 }
 0x13a   : > { %v1021_v53 = vpop.f32.mrf.mxu0  ;;  %2870 = vmatmul.mubr.msk.f32.gmra.mxu0 %vm358_vm1, %v265_v49  ;;  %v1416_v54 = vpop.f32.mrf.mxu1  ;;  %3107 = vmatmul.mubr.msk.f32.gmra.mxu1 %vm358_vm1, %v344_v50 }
 0x13b   : > { %v1022_v55 = vadd.f32 %v3770_v38, %v1021_v53  ;;  %v1417_v56 = vadd.f32 %v3770_v38, %v1416_v54  ;;  %2872 = vmatprep.mubr.msk.f32.mxu0 %vm3306_vm0, %v3305_v1  ;;  %3109 = vmatprep.mubr.msk.f32.mxu1 %vm3306_vm0, %v3305_v1 }
 0x13c   : > { %v2727_v59 = vpop.f32.mrf.mxu0  ;;  %v2964_v60 = vpop.f32.mrf.mxu1 }
 0x13d   : > { %1706 = vst.msk [vmem:[%s3782_s8 + $0xc8] sm:$0xff] %vm1680_vm2, %v1022_v55  ;;  %1785 = vst.msk [vmem:[%s3782_s8 + $0x340] sm:$0xff] %vm1680_vm2, %v1417_v56 }
 0x13e   : > { %v1026_v61 = vpop.f32.mrf.mxu0  ;;  %2873 = vmatmul.mubr.msk.f32.gmra.mxu0 %vm358_vm1, %v266_v57  ;;  %v1421_v62 = vpop.f32.mrf.mxu1  ;;  %3110 = vmatmul.mubr.msk.f32.gmra.mxu1 %vm358_vm1, %v345_v58 }
 0x13f   : > { %v1027_v63 = vadd.f32 %v3770_v38, %v1026_v61  ;;  %v1422_v0 = vadd.f32 %v3770_v38, %v1421_v62  ;;  %2875 = vmatprep.mubr.msk.f32.mxu0 %vm3306_vm0, %v3305_v1  ;;  %3112 = vmatprep.mubr.msk.f32.mxu1 %vm3306_vm0, %v3305_v1 }
 0x140   : > { %v2730_v4 = vpop.f32.mrf.mxu0  ;;  %v2967_v5 = vpop.f32.mrf.mxu1 }
 0x141   : > { %1707 = vst.msk [vmem:[%s3782_s8 + $0xd0] sm:$0xff] %vm1680_vm2, %v1027_v63  ;;  %1786 = vst.msk [vmem:[%s3782_s8 + $0x348] sm:$0xff] %vm1680_vm2, %v1422_v0 }
 0x142   : > { %v1031_v6 = vpop.f32.mrf.mxu0  ;;  %2876 = vmatmul.mubr.msk.f32.gmra.mxu0 %vm358_vm1, %v267_v2  ;;  %v1426_v7 = vpop.f32.mrf.mxu1  ;;  %3113 = vmatmul.mubr.msk.f32.gmra.mxu1 %vm358_vm1, %v346_v3 }
 0x143   : > { %v1032_v8 = vadd.f32 %v3770_v38, %v1031_v6  ;;  %v1427_v9 = vadd.f32 %v3770_v38, %v1426_v7  ;;  %2878 = vmatprep.mubr.msk.f32.mxu0 %vm3306_vm0, %v3305_v1  ;;  %3115 = vmatprep.mubr.msk.f32.mxu1 %vm3306_vm0, %v3305_v1 }
 0x144   : > { %v2733_v12 = vpop.f32.mrf.mxu0  ;;  %v2970_v13 = vpop.f32.mrf.mxu1 }
 0x145   : > { %1708 = vst.msk [vmem:[%s3782_s8 + $0xd8] sm:$0xff] %vm1680_vm2, %v1032_v8  ;;  %1787 = vst.msk [vmem:[%s3782_s8 + $0x350] sm:$0xff] %vm1680_vm2, %v1427_v9 }
 0x146   : > { %v1036_v14 = vpop.f32.mrf.mxu0  ;;  %2879 = vmatmul.mubr.msk.f32.gmra.mxu0 %vm358_vm1, %v268_v10  ;;  %v1431_v15 = vpop.f32.mrf.mxu1  ;;  %3116 = vmatmul.mubr.msk.f32.gmra.mxu1 %vm358_vm1, %v347_v11 }
 0x147   : > { %v1037_v16 = vadd.f32 %v3770_v38, %v1036_v14  ;;  %v1432_v17 = vadd.f32 %v3770_v38, %v1431_v15  ;;  %2881 = vmatprep.mubr.msk.f32.mxu0 %vm3306_vm0, %v3305_v1  ;;  %3118 = vmatprep.mubr.msk.f32.mxu1 %vm3306_vm0, %v3305_v1 }
 0x148   : > { %v2736_v20 = vpop.f32.mrf.mxu0  ;;  %v2973_v21 = vpop.f32.mrf.mxu1 }
 0x149   : > { %1709 = vst.msk [vmem:[%s3782_s8 + $0xe0] sm:$0xff] %vm1680_vm2, %v1037_v16  ;;  %1788 = vst.msk [vmem:[%s3782_s8 + $0x358] sm:$0xff] %vm1680_vm2, %v1432_v17 }
 0x14a   : > { %v1041_v22 = vpop.f32.mrf.mxu0  ;;  %2882 = vmatmul.mubr.msk.f32.gmra.mxu0 %vm358_vm1, %v269_v18  ;;  %v1436_v23 = vpop.f32.mrf.mxu1  ;;  %3119 = vmatmul.mubr.msk.f32.gmra.mxu1 %vm358_vm1, %v348_v19 }
 0x14b   : > { %v1042_v24 = vadd.f32 %v3770_v38, %v1041_v22  ;;  %v1437_v25 = vadd.f32 %v3770_v38, %v1436_v23  ;;  %2884 = vmatprep.mubr.msk.f32.mxu0 %vm3306_vm0, %v3305_v1 }
 0x14c   : > { %v2739_v27 = vpop.f32.mrf.mxu0  ;;  %v2976_v28 = vpop.f32.mrf.mxu1 }
 0x14d   : > { %1710 = vst.msk [vmem:[%s3782_s8 + $0xe8] sm:$0xff] %vm1680_vm2, %v1042_v24  ;;  %1789 = vst.msk [vmem:[%s3782_s8 + $0x360] sm:$0xff] %vm1680_vm2, %v1437_v25 }
 0x14e   : > { %v1046_v29 = vpop.f32.mrf.mxu0  ;;  %2885 = vmatmul.mubr.msk.f32.gmra.mxu0 %vm358_vm1, %v270_v26  ;;  %v1441_v30 = vpop.f32.mrf.mxu1 }
 0x14f   : > { %v1047_v31 = vadd.f32 %v3770_v38, %v1046_v29  ;;  %v1442_v32 = vadd.f32 %v3770_v38, %v1441_v30 }
 0x150   : > { %v2742_v33 = vpop.f32.mrf.mxu0  ;;  %v2979_v34 = vpop.f32.mrf.mxu1 }
 0x151   : > { %1711 = vst.msk [vmem:[%s3782_s8 + $0xf0] sm:$0xff] %vm1680_vm2, %v1047_v31  ;;  %1790 = vst.msk [vmem:[%s3782_s8 + $0x368] sm:$0xff] %vm1680_vm2, %v1442_v32  ;;  %v4261_v34 = vld [vmem:[%s4696_s2] ss:$0 sm:$0xff] }
 0x152   : > { %v1051_v1 = vpop.f32.mrf.mxu0  ;;  %v1446_v35 = vpop.f32.mrf.mxu1 }
 0x153   : > { %v1052_v36 = vadd.f32 %v3770_v38, %v1051_v1  ;;  %v1447_v37 = vadd.f32 %v3770_v38, %v1446_v35 }
 0x154   : > { %v2745_v39 = vpop.f32.mrf.mxu0  ;;  %v2982_v40 = vpop.f32.mrf.mxu1 }
 0x155   : > { %1712 = vst.msk [vmem:[%s3782_s8 + $0xf8] sm:$0xff] %vm1680_vm2, %v1052_v36  ;;  %1791 = vst.msk [vmem:[%s3782_s8 + $0x370] sm:$0xff] %vm1680_vm2, %v1447_v37 }
 0x156   : > { %v1056_v41 = vpop.f32.mrf.mxu0  ;;  %v1451_v42 = vpop.f32.mrf.mxu1 }
 0x157   : > { %v1057_v43 = vadd.f32 %v3770_v38, %v1056_v41  ;;  %v1452_v44 = vadd.f32 %v3770_v38, %v1451_v42 }
 0x158   : > { %v2748_v45 = vpop.f32.mrf.mxu0  ;;  %v2985_v46 = vpop.f32.mrf.mxu1 }
 0x159   : > { %1713 = vst.msk [vmem:[%s3782_s8 + $0x100] sm:$0xff] %vm1680_vm2, %v1057_v43  ;;  %1792 = vst.msk [vmem:[%s3782_s8 + $0x378] sm:$0xff] %vm1680_vm2, %v1452_v44 }
 0x15a   : > { %v1061_v47 = vpop.f32.mrf.mxu0  ;;  %v1456_v48 = vpop.f32.mrf.mxu1 }
 0x15b   : > { %v1062_v49 = vadd.f32 %v3770_v38, %v1061_v47  ;;  %v1457_v50 = vadd.f32 %v3770_v38, %v1456_v48 }
 0x15c   : > { %v2751_v51 = vpop.f32.mrf.mxu0  ;;  %v2988_v52 = vpop.f32.mrf.mxu1 }
 0x15d   : > { %1714 = vst.msk [vmem:[%s3782_s8 + $0x108] sm:$0xff] %vm1680_vm2, %v1062_v49  ;;  %1793 = vst.msk [vmem:[%s3782_s8 + $0x380] sm:$0xff] %vm1680_vm2, %v1457_v50 }
 0x15e   : > { %v1066_v53 = vpop.f32.mrf.mxu0  ;;  %v1461_v54 = vpop.f32.mrf.mxu1 }
 0x15f   : > { %v1067_v55 = vadd.f32 %v3770_v38, %v1066_v53  ;;  %v1462_v56 = vadd.f32 %v3770_v38, %v1461_v54 }
 0x160   : > { %v2754_v57 = vpop.f32.mrf.mxu0  ;;  %v2991_v58 = vpop.f32.mrf.mxu1 }
 0x161   : > { %1715 = vst.msk [vmem:[%s3782_s8 + $0x110] sm:$0xff] %vm1680_vm2, %v1067_v55  ;;  %1794 = vst.msk [vmem:[%s3782_s8 + $0x388] sm:$0xff] %vm1680_vm2, %v1462_v56 }
 0x162   : > { %v1071_v59 = vpop.f32.mrf.mxu0  ;;  %v1466_v60 = vpop.f32.mrf.mxu1 }
 0x163   : > { %v1072_v61 = vadd.f32 %v3770_v38, %v1071_v59  ;;  %v1467_v62 = vadd.f32 %v3770_v38, %v1466_v60 }
 0x164   : > { %v2757_v63 = vpop.f32.mrf.mxu0  ;;  %v2994_v0 = vpop.f32.mrf.mxu1 }
 0x165   : > { %1716 = vst.msk [vmem:[%s3782_s8 + $0x118] sm:$0xff] %vm1680_vm2, %v1072_v61  ;;  %1795 = vst.msk [vmem:[%s3782_s8 + $0x390] sm:$0xff] %vm1680_vm2, %v1467_v62 }
 0x166   : > { %v1076_v2 = vpop.f32.mrf.mxu0  ;;  %v1471_v3 = vpop.f32.mrf.mxu1 }
 0x167   : > { %v1077_v4 = vadd.f32 %v3770_v38, %v1076_v2  ;;  %v1472_v5 = vadd.f32 %v3770_v38, %v1471_v3 }
 0x168   : > { %v2760_v6 = vpop.f32.mrf.mxu0  ;;  %v2997_v7 = vpop.f32.mrf.mxu1 }
 0x169   : > { %1717 = vst.msk [vmem:[%s3782_s8 + $0x120] sm:$0xff] %vm1680_vm2, %v1077_v4  ;;  %1796 = vst.msk [vmem:[%s3782_s8 + $0x398] sm:$0xff] %vm1680_vm2, %v1472_v5 }
 0x16a   : > { %v1081_v8 = vpop.f32.mrf.mxu0  ;;  %v1476_v9 = vpop.f32.mrf.mxu1 }
 0x16b   : > { %v1082_v10 = vadd.f32 %v3770_v38, %v1081_v8  ;;  %v1477_v11 = vadd.f32 %v3770_v38, %v1476_v9 }
 0x16c   : > { %v2763_v12 = vpop.f32.mrf.mxu0  ;;  %v3000_v13 = vpop.f32.mrf.mxu1 }
 0x16d   : > { %1718 = vst.msk [vmem:[%s3782_s8 + $0x128] sm:$0xff] %vm1680_vm2, %v1082_v10  ;;  %1797 = vst.msk [vmem:[%s3782_s8 + $0x3a0] sm:$0xff] %vm1680_vm2, %v1477_v11 }
 0x16e   : > { %v1086_v14 = vpop.f32.mrf.mxu0  ;;  %v1481_v15 = vpop.f32.mrf.mxu1 }
 0x16f   : > { %v1087_v16 = vadd.f32 %v3770_v38, %v1086_v14  ;;  %v1482_v17 = vadd.f32 %v3770_v38, %v1481_v15 }
 0x170   : > { %v2766_v18 = vpop.f32.mrf.mxu0  ;;  %v3003_v19 = vpop.f32.mrf.mxu1 }
 0x171   : > { %1719 = vst.msk [vmem:[%s3782_s8 + $0x130] sm:$0xff] %vm1680_vm2, %v1087_v16  ;;  %1798 = vst.msk [vmem:[%s3782_s8 + $0x3a8] sm:$0xff] %vm1680_vm2, %v1482_v17 }
 0x172   : > { %v1091_v20 = vpop.f32.mrf.mxu0  ;;  %v1486_v21 = vpop.f32.mrf.mxu1 }
 0x173   : > { %v1092_v22 = vadd.f32 %v3770_v38, %v1091_v20  ;;  %v1487_v23 = vadd.f32 %v3770_v38, %v1486_v21 }
 0x174   : > { %v2769_v24 = vpop.f32.mrf.mxu0  ;;  %v3006_v25 = vpop.f32.mrf.mxu1 }
 0x175   : > { %1720 = vst.msk [vmem:[%s3782_s8 + $0x138] sm:$0xff] %vm1680_vm2, %v1092_v22  ;;  %1799 = vst.msk [vmem:[%s3782_s8 + $0x3b0] sm:$0xff] %vm1680_vm2, %v1487_v23 }
 0x176   : > { %v1096_v26 = vpop.f32.mrf.mxu0  ;;  %v1491_v27 = vpop.f32.mrf.mxu1 }
 0x177   : > { %v1097_v28 = vadd.f32 %v3770_v38, %v1096_v26  ;;  %v1492_v29 = vadd.f32 %v3770_v38, %v1491_v27 }
 0x178   : > { %v2772_v30 = vpop.f32.mrf.mxu0  ;;  %v3009_v31 = vpop.f32.mrf.mxu1 }
 0x179   : > { %1721 = vst.msk [vmem:[%s3782_s8 + $0x140] sm:$0xff] %vm1680_vm2, %v1097_v28  ;;  %1800 = vst.msk [vmem:[%s3782_s8 + $0x3b8] sm:$0xff] %vm1680_vm2, %v1492_v29 }
 0x17a   : > { %v1101_v32 = vpop.f32.mrf.mxu0  ;;  %v1496_v33 = vpop.f32.mrf.mxu1 }
 0x17b   : > { %v1102_v1 = vadd.f32 %v4261_v34, %v1101_v32  ;;  %v1497_v35 = vadd.f32 %v4261_v34, %v1496_v33 }
 0x17c   : > { %v2775_v38 = vpop.f32.mrf.mxu0  ;;  %v3012_v36 = vpop.f32.mrf.mxu1 }
 0x17d   : > { %1722 = vst.msk [vmem:[%s3782_s8 + $0x148] sm:$0xff] %vm1680_vm2, %v1102_v1  ;;  %1801 = vst.msk [vmem:[%s3782_s8 + $0x3c0] sm:$0xff] %vm1680_vm2, %v1497_v35 }
 0x17e   : > { %v1106_v37 = vpop.f32.mrf.mxu0  ;;  %v1501_v39 = vpop.f32.mrf.mxu1 }
 0x17f   : > { %v1107_v40 = vadd.f32 %v4261_v34, %v1106_v37  ;;  %v1502_v41 = vadd.f32 %v4261_v34, %v1501_v39 }
 0x180   : > { %v2778_v42 = vpop.f32.mrf.mxu0  ;;  %v3015_v43 = vpop.f32.mrf.mxu1 }
 0x181   : > { %1723 = vst.msk [vmem:[%s3782_s8 + $0x150] sm:$0xff] %vm1680_vm2, %v1107_v40  ;;  %1802 = vst.msk [vmem:[%s3782_s8 + $0x3c8] sm:$0xff] %vm1680_vm2, %v1502_v41 }
 0x182   : > { %v1111_v44 = vpop.f32.mrf.mxu0  ;;  %v1506_v45 = vpop.f32.mrf.mxu1 }
 0x183   : > { %v1112_v46 = vadd.f32 %v4261_v34, %v1111_v44  ;;  %v1507_v47 = vadd.f32 %v4261_v34, %v1506_v45 }
 0x184   : > { %v2781_v48 = vpop.f32.mrf.mxu0  ;;  %v3018_v49 = vpop.f32.mrf.mxu1 }
 0x185   : > { %1724 = vst.msk [vmem:[%s3782_s8 + $0x158] sm:$0xff] %vm1680_vm2, %v1112_v46  ;;  %1803 = vst.msk [vmem:[%s3782_s8 + $0x3d0] sm:$0xff] %vm1680_vm2, %v1507_v47 }
 0x186   : > { %v1116_v50 = vpop.f32.mrf.mxu0  ;;  %v1511_v51 = vpop.f32.mrf.mxu1 }
 0x187   : > { %v1117_v52 = vadd.f32 %v4261_v34, %v1116_v50  ;;  %v1512_v53 = vadd.f32 %v4261_v34, %v1511_v51 }
 0x188   : > { %v2784_v54 = vpop.f32.mrf.mxu0  ;;  %v3021_v55 = vpop.f32.mrf.mxu1 }
 0x189   : > { %1725 = vst.msk [vmem:[%s3782_s8 + $0x160] sm:$0xff] %vm1680_vm2, %v1117_v52  ;;  %1804 = vst.msk [vmem:[%s3782_s8 + $0x3d8] sm:$0xff] %vm1680_vm2, %v1512_v53 }
 0x18a   : > { %v1121_v56 = vpop.f32.mrf.mxu0  ;;  %v1516_v57 = vpop.f32.mrf.mxu1 }
 0x18b   : > { %v1122_v58 = vadd.f32 %v4261_v34, %v1121_v56  ;;  %v1517_v59 = vadd.f32 %v4261_v34, %v1516_v57 }
 0x18c   : > { %v2787_v60 = vpop.f32.mrf.mxu0  ;;  %v3024_v61 = vpop.f32.mrf.mxu1 }
 0x18d   : > { %1726 = vst.msk [vmem:[%s3782_s8 + $0x168] sm:$0xff] %vm1680_vm2, %v1122_v58  ;;  %1805 = vst.msk [vmem:[%s3782_s8 + $0x3e0] sm:$0xff] %vm1680_vm2, %v1517_v59 }
 0x18e   : > { %v1126_v62 = vpop.f32.mrf.mxu0  ;;  %v1521_v63 = vpop.f32.mrf.mxu1 }
 0x18f   : > { %v1127_v0 = vadd.f32 %v4261_v34, %v1126_v62  ;;  %v1522_v2 = vadd.f32 %v4261_v34, %v1521_v63 }
 0x190   : > { %v2790_v3 = vpop.f32.mrf.mxu0  ;;  %v3027_v4 = vpop.f32.mrf.mxu1 }
 0x191   : > { %1727 = vst.msk [vmem:[%s3782_s8 + $0x170] sm:$0xff] %vm1680_vm2, %v1127_v0  ;;  %1806 = vst.msk [vmem:[%s3782_s8 + $0x3e8] sm:$0xff] %vm1680_vm2, %v1522_v2 }
 0x192   : > { %v1131_v5 = vpop.f32.mrf.mxu0  ;;  %v1526_v6 = vpop.f32.mrf.mxu1 }
 0x193   : > { %v1132_v7 = vadd.f32 %v4261_v34, %v1131_v5  ;;  %v1527_v8 = vadd.f32 %v4261_v34, %v1526_v6 }
 0x194   : > { %v2793_v9 = vpop.f32.mrf.mxu0  ;;  %v3030_v10 = vpop.f32.mrf.mxu1 }
 0x195   : > { %1728 = vst.msk [vmem:[%s3782_s8 + $0x178] sm:$0xff] %vm1680_vm2, %v1132_v7  ;;  %1807 = vst.msk [vmem:[%s3782_s8 + $0x3f0] sm:$0xff] %vm1680_vm2, %v1527_v8 }
 0x196   : > { %v1136_v11 = vpop.f32.mrf.mxu0  ;;  %v1531_v12 = vpop.f32.mrf.mxu1 }
 0x197   : > { %v1137_v13 = vadd.f32 %v4261_v34, %v1136_v11  ;;  %v1532_v14 = vadd.f32 %v4261_v34, %v1531_v12 }
 0x198   : > { %v2796_v15 = vpop.f32.mrf.mxu0  ;;  %v3033_v16 = vpop.f32.mrf.mxu1 }
 0x199   : > { %1729 = vst.msk [vmem:[%s3782_s8 + $0x180] sm:$0xff] %vm1680_vm2, %v1137_v13  ;;  %1808 = vst.msk [vmem:[%s3782_s8 + $0x3f8] sm:$0xff] %vm1680_vm2, %v1532_v14 }
 0x19a   : > { %v1141_v17 = vpop.f32.mrf.mxu0  ;;  %v1536_v18 = vpop.f32.mrf.mxu1 }
 0x19b   : > { %v1142_v19 = vadd.f32 %v4261_v34, %v1141_v17  ;;  %v1537_v20 = vadd.f32 %v4261_v34, %v1536_v18 }
 0x19c   : > { %v2799_v21 = vpop.f32.mrf.mxu0  ;;  %v3036_v22 = vpop.f32.mrf.mxu1 }
 0x19d   : > { %1730 = vst.msk [vmem:[%s3782_s8 + $0x188] sm:$0xff] %vm1680_vm2, %v1142_v19  ;;  %1809 = vst.msk [vmem:[%s3782_s8 + $0x400] sm:$0xff] %vm1680_vm2, %v1537_v20 }
 0x19e   : > { %v1146_v23 = vpop.f32.mrf.mxu0  ;;  %v1541_v24 = vpop.f32.mrf.mxu1 }
 0x19f   : > { %v1147_v25 = vadd.f32 %v4261_v34, %v1146_v23  ;;  %v1542_v26 = vadd.f32 %v4261_v34, %v1541_v24 }
 0x1a0   : > { %v2802_v27 = vpop.f32.mrf.mxu0  ;;  %v3039_v28 = vpop.f32.mrf.mxu1 }
 0x1a1   : > { %1731 = vst.msk [vmem:[%s3782_s8 + $0x190] sm:$0xff] %vm1680_vm2, %v1147_v25  ;;  %1810 = vst.msk [vmem:[%s3782_s8 + $0x408] sm:$0xff] %vm1680_vm2, %v1542_v26 }
 0x1a2   : > { %v1151_v29 = vpop.f32.mrf.mxu0  ;;  %v1546_v30 = vpop.f32.mrf.mxu1 }
 0x1a3   : > { %v1152_v31 = vadd.f32 %v4261_v34, %v1151_v29  ;;  %v1547_v32 = vadd.f32 %v4261_v34, %v1546_v30 }
 0x1a4   : > { %v2805_v33 = vpop.f32.mrf.mxu0  ;;  %v3042_v1 = vpop.f32.mrf.mxu1 }
 0x1a5   : > { %1732 = vst.msk [vmem:[%s3782_s8 + $0x198] sm:$0xff] %vm1680_vm2, %v1152_v31  ;;  %1811 = vst.msk [vmem:[%s3782_s8 + $0x410] sm:$0xff] %vm1680_vm2, %v1547_v32 }
 0x1a6   : > { %v1156_v35 = vpop.f32.mrf.mxu0  ;;  %v1551_v38 = vpop.f32.mrf.mxu1 }
 0x1a7   : > { %v1157_v36 = vadd.f32 %v4261_v34, %v1156_v35  ;;  %v1552_v37 = vadd.f32 %v4261_v34, %v1551_v38 }
 0x1a8   : > { %v2808_v39 = vpop.f32.mrf.mxu0  ;;  %v3045_v40 = vpop.f32.mrf.mxu1 }
 0x1a9   : > { %1733 = vst.msk [vmem:[%s3782_s8 + $0x1a0] sm:$0xff] %vm1680_vm2, %v1157_v36  ;;  %1812 = vst.msk [vmem:[%s3782_s8 + $0x418] sm:$0xff] %vm1680_vm2, %v1552_v37 }
 0x1aa   : > { %v1161_v41 = vpop.f32.mrf.mxu0  ;;  %v1556_v42 = vpop.f32.mrf.mxu1 }
 0x1ab   : > { %v1162_v43 = vadd.f32 %v4261_v34, %v1161_v41  ;;  %v1557_v44 = vadd.f32 %v4261_v34, %v1556_v42 }
 0x1ac   : > { %v2811_v45 = vpop.f32.mrf.mxu0  ;;  %v3048_v46 = vpop.f32.mrf.mxu1 }
 0x1ad   : > { %1734 = vst.msk [vmem:[%s3782_s8 + $0x1a8] sm:$0xff] %vm1680_vm2, %v1162_v43  ;;  %1813 = vst.msk [vmem:[%s3782_s8 + $0x420] sm:$0xff] %vm1680_vm2, %v1557_v44 }
 0x1ae   : > { %v1166_v47 = vpop.f32.mrf.mxu0  ;;  %v1561_v48 = vpop.f32.mrf.mxu1 }
 0x1af   : > { %v1167_v49 = vadd.f32 %v4261_v34, %v1166_v47  ;;  %v1562_v50 = vadd.f32 %v4261_v34, %v1561_v48 }
 0x1b0   : > { %v2814_v51 = vpop.f32.mrf.mxu0  ;;  %v3051_v52 = vpop.f32.mrf.mxu1 }
 0x1b1   : > { %1735 = vst.msk [vmem:[%s3782_s8 + $0x1b0] sm:$0xff] %vm1680_vm2, %v1167_v49  ;;  %1814 = vst.msk [vmem:[%s3782_s8 + $0x428] sm:$0xff] %vm1680_vm2, %v1562_v50 }
 0x1b2   : > { %v1171_v53 = vpop.f32.mrf.mxu0  ;;  %v1566_v54 = vpop.f32.mrf.mxu1 }
 0x1b3   : > { %v1172_v55 = vadd.f32 %v4261_v34, %v1171_v53  ;;  %v1567_v56 = vadd.f32 %v4261_v34, %v1566_v54 }
 0x1b4   : > { %v2817_v57 = vpop.f32.mrf.mxu0  ;;  %v3054_v58 = vpop.f32.mrf.mxu1 }
 0x1b5   : > { %1736 = vst.msk [vmem:[%s3782_s8 + $0x1b8] sm:$0xff] %vm1680_vm2, %v1172_v55  ;;  %1815 = vst.msk [vmem:[%s3782_s8 + $0x430] sm:$0xff] %vm1680_vm2, %v1567_v56 }
 0x1b6   : > { %v1176_v59 = vpop.f32.mrf.mxu0  ;;  %v1571_v60 = vpop.f32.mrf.mxu1 }
 0x1b7   : > { %v1177_v61 = vadd.f32 %v4261_v34, %v1176_v59  ;;  %v1572_v62 = vadd.f32 %v4261_v34, %v1571_v60 }
 0x1b8   : > { %v2820_v63 = vpop.f32.mrf.mxu0  ;;  %v3057_v0 = vpop.f32.mrf.mxu1 }
 0x1b9   : > { %1737 = vst.msk [vmem:[%s3782_s8 + $0x1c0] sm:$0xff] %vm1680_vm2, %v1177_v61  ;;  %1816 = vst.msk [vmem:[%s3782_s8 + $0x438] sm:$0xff] %vm1680_vm2, %v1572_v62 }
 0x1ba   : > { %v1181_v2 = vpop.f32.mrf.mxu0  ;;  %v1576_v3 = vpop.f32.mrf.mxu1 }
 0x1bb   : > { %v1182_v4 = vadd.f32 %v4261_v34, %v1181_v2  ;;  %v1577_v5 = vadd.f32 %v4261_v34, %v1576_v3 }
 0x1bc   : > { %v2823_v6 = vpop.f32.mrf.mxu0  ;;  %v3060_v7 = vpop.f32.mrf.mxu1 }
 0x1bd   : > { %1738 = vst.msk [vmem:[%s3782_s8 + $0x1c8] sm:$0xff] %vm1680_vm2, %v1182_v4  ;;  %1817 = vst.msk [vmem:[%s3782_s8 + $0x440] sm:$0xff] %vm1680_vm2, %v1577_v5 }
 0x1be   : > { %v1186_v8 = vpop.f32.mrf.mxu0  ;;  %v1581_v9 = vpop.f32.mrf.mxu1 }
 0x1bf   : > { %v1187_v10 = vadd.f32 %v4261_v34, %v1186_v8  ;;  %v1582_v11 = vadd.f32 %v4261_v34, %v1581_v9 }
 0x1c0   : > { %v2826_v12 = vpop.f32.mrf.mxu0  ;;  %v3063_v13 = vpop.f32.mrf.mxu1 }
 0x1c1   : > { %1739 = vst.msk [vmem:[%s3782_s8 + $0x1d0] sm:$0xff] %vm1680_vm2, %v1187_v10  ;;  %1818 = vst.msk [vmem:[%s3782_s8 + $0x448] sm:$0xff] %vm1680_vm2, %v1582_v11 }
 0x1c2   : > { %v1191_v14 = vpop.f32.mrf.mxu0  ;;  %v1586_v15 = vpop.f32.mrf.mxu1 }
 0x1c3   : > { %v1192_v16 = vadd.f32 %v4261_v34, %v1191_v14  ;;  %v1587_v17 = vadd.f32 %v4261_v34, %v1586_v15 }
 0x1c4   : > { %v2829_v18 = vpop.f32.mrf.mxu0  ;;  %v3066_v19 = vpop.f32.mrf.mxu1 }
 0x1c5   : > { %1740 = vst.msk [vmem:[%s3782_s8 + $0x1d8] sm:$0xff] %vm1680_vm2, %v1192_v16  ;;  %1819 = vst.msk [vmem:[%s3782_s8 + $0x450] sm:$0xff] %vm1680_vm2, %v1587_v17 }
 0x1c6   : > { %v1196_v20 = vpop.f32.mrf.mxu0  ;;  %v1591_v21 = vpop.f32.mrf.mxu1 }
 0x1c7   : > { %v1197_v22 = vadd.f32 %v4261_v34, %v1196_v20  ;;  %v1592_v23 = vadd.f32 %v4261_v34, %v1591_v21 }
 0x1c8   : > { %v2832_v24 = vpop.f32.mrf.mxu0  ;;  %v3069_v25 = vpop.f32.mrf.mxu1 }
 0x1c9   : > { %1741 = vst.msk [vmem:[%s3782_s8 + $0x1e0] sm:$0xff] %vm1680_vm2, %v1197_v22  ;;  %1820 = vst.msk [vmem:[%s3782_s8 + $0x458] sm:$0xff] %vm1680_vm2, %v1592_v23 }
 0x1ca   : > { %v1201_v26 = vpop.f32.mrf.mxu0  ;;  %v1596_v27 = vpop.f32.mrf.mxu1 }
 0x1cb   : > { %v1202_v28 = vadd.f32 %v4261_v34, %v1201_v26  ;;  %v1597_v29 = vadd.f32 %v4261_v34, %v1596_v27 }
 0x1cc   : > { %v2835_v30 = vpop.f32.mrf.mxu0  ;;  %v3072_v31 = vpop.f32.mrf.mxu1 }
 0x1cd   : > { %1742 = vst.msk [vmem:[%s3782_s8 + $0x1e8] sm:$0xff] %vm1680_vm2, %v1202_v28  ;;  %1821 = vst.msk [vmem:[%s3782_s8 + $0x460] sm:$0xff] %vm1680_vm2, %v1597_v29 }
 0x1ce   : > { %v1206_v32 = vpop.f32.mrf.mxu0  ;;  %v1601_v33 = vpop.f32.mrf.mxu1 }
 0x1cf   : > { %v1207_v1 = vadd.f32 %v4261_v34, %v1206_v32  ;;  %v1602_v35 = vadd.f32 %v4261_v34, %v1601_v33 }
 0x1d0   : > { %v2838_v38 = vpop.f32.mrf.mxu0  ;;  %v3075_v36 = vpop.f32.mrf.mxu1 }
 0x1d1   : > { %1743 = vst.msk [vmem:[%s3782_s8 + $0x1f0] sm:$0xff] %vm1680_vm2, %v1207_v1  ;;  %1822 = vst.msk [vmem:[%s3782_s8 + $0x468] sm:$0xff] %vm1680_vm2, %v1602_v35 }
 0x1d2   : > { %v1211_v37 = vpop.f32.mrf.mxu0  ;;  %v1606_v39 = vpop.f32.mrf.mxu1 }
 0x1d3   : > { %v1212_v40 = vadd.f32 %v4261_v34, %v1211_v37  ;;  %v1607_v41 = vadd.f32 %v4261_v34, %v1606_v39 }
 0x1d4   : > { %v2841_v42 = vpop.f32.mrf.mxu0  ;;  %v3078_v43 = vpop.f32.mrf.mxu1 }
 0x1d5   : > { %1744 = vst.msk [vmem:[%s3782_s8 + $0x1f8] sm:$0xff] %vm1680_vm2, %v1212_v40  ;;  %1823 = vst.msk [vmem:[%s3782_s8 + $0x470] sm:$0xff] %vm1680_vm2, %v1607_v41 }
 0x1d6   : > { %v1216_v44 = vpop.f32.mrf.mxu0  ;;  %v1611_v45 = vpop.f32.mrf.mxu1 }
 0x1d7   : > { %v1217_v46 = vadd.f32 %v4261_v34, %v1216_v44  ;;  %v1612_v47 = vadd.f32 %v4261_v34, %v1611_v45 }
 0x1d8   : > { %v2844_v48 = vpop.f32.mrf.mxu0  ;;  %v3081_v49 = vpop.f32.mrf.mxu1 }
 0x1d9   : > { %1745 = vst.msk [vmem:[%s3782_s8 + $0x200] sm:$0xff] %vm1680_vm2, %v1217_v46  ;;  %1824 = vst.msk [vmem:[%s3782_s8 + $0x478] sm:$0xff] %vm1680_vm2, %v1612_v47 }
 0x1da   : > { %v1221_v50 = vpop.f32.mrf.mxu0  ;;  %v1616_v51 = vpop.f32.mrf.mxu1 }
 0x1db   : > { %v1222_v52 = vadd.f32 %v4261_v34, %v1221_v50  ;;  %v1617_v53 = vadd.f32 %v4261_v34, %v1616_v51 }
 0x1dc   : > { %v2847_v54 = vpop.f32.mrf.mxu0  ;;  %v3084_v55 = vpop.f32.mrf.mxu1 }
 0x1dd   : > { %1746 = vst.msk [vmem:[%s3782_s8 + $0x208] sm:$0xff] %vm1680_vm2, %v1222_v52  ;;  %1825 = vst.msk [vmem:[%s3782_s8 + $0x480] sm:$0xff] %vm1680_vm2, %v1617_v53 }
 0x1de   : > { %v1226_v56 = vpop.f32.mrf.mxu0  ;;  %v1621_v57 = vpop.f32.mrf.mxu1 }
 0x1df   : > { %v1227_v58 = vadd.f32 %v4261_v34, %v1226_v56  ;;  %v1622_v59 = vadd.f32 %v4261_v34, %v1621_v57 }
 0x1e0   : > { %v2850_v60 = vpop.f32.mrf.mxu0  ;;  %v3087_v61 = vpop.f32.mrf.mxu1 }
 0x1e1   : > { %1747 = vst.msk [vmem:[%s3782_s8 + $0x210] sm:$0xff] %vm1680_vm2, %v1227_v58  ;;  %1826 = vst.msk [vmem:[%s3782_s8 + $0x488] sm:$0xff] %vm1680_vm2, %v1622_v59 }
 0x1e2   : > { %v1231_v62 = vpop.f32.mrf.mxu0  ;;  %v1626_v63 = vpop.f32.mrf.mxu1 }
 0x1e3   : > { %v1232_v0 = vadd.f32 %v4261_v34, %v1231_v62  ;;  %v1627_v2 = vadd.f32 %v4261_v34, %v1626_v63 }
 0x1e4   : > { %v2853_v3 = vpop.f32.mrf.mxu0  ;;  %v3090_v4 = vpop.f32.mrf.mxu1 }
 0x1e5   : > { %1748 = vst.msk [vmem:[%s3782_s8 + $0x218] sm:$0xff] %vm1680_vm2, %v1232_v0  ;;  %1827 = vst.msk [vmem:[%s3782_s8 + $0x490] sm:$0xff] %vm1680_vm2, %v1627_v2 }
 0x1e6   : > { %v1236_v5 = vpop.f32.mrf.mxu0  ;;  %v1631_v6 = vpop.f32.mrf.mxu1 }
 0x1e7   : > { %v1237_v7 = vadd.f32 %v4261_v34, %v1236_v5  ;;  %v1632_v8 = vadd.f32 %v4261_v34, %v1631_v6 }
 0x1e8   : > { %v2856_v9 = vpop.f32.mrf.mxu0  ;;  %v3093_v10 = vpop.f32.mrf.mxu1 }
 0x1e9   : > { %1749 = vst.msk [vmem:[%s3782_s8 + $0x220] sm:$0xff] %vm1680_vm2, %v1237_v7  ;;  %1828 = vst.msk [vmem:[%s3782_s8 + $0x498] sm:$0xff] %vm1680_vm2, %v1632_v8 }
 0x1ea   : > { %v1241_v11 = vpop.f32.mrf.mxu0  ;;  %v1636_v12 = vpop.f32.mrf.mxu1 }
 0x1eb   : > { %v1242_v13 = vadd.f32 %v4261_v34, %v1241_v11  ;;  %v1637_v14 = vadd.f32 %v4261_v34, %v1636_v12 }
 0x1ec   : > { %v2859_v15 = vpop.f32.mrf.mxu0  ;;  %v3096_v16 = vpop.f32.mrf.mxu1 }
 0x1ed   : > { %1750 = vst.msk [vmem:[%s3782_s8 + $0x228] sm:$0xff] %vm1680_vm2, %v1242_v13  ;;  %1829 = vst.msk [vmem:[%s3782_s8 + $0x4a0] sm:$0xff] %vm1680_vm2, %v1637_v14 }
 0x1ee   : > { %v1246_v17 = vpop.f32.mrf.mxu0  ;;  %v1641_v18 = vpop.f32.mrf.mxu1 }
 0x1ef   : > { %v1247_v19 = vadd.f32 %v4261_v34, %v1246_v17  ;;  %v1642_v20 = vadd.f32 %v4261_v34, %v1641_v18 }
 0x1f0   : > { %v2862_v21 = vpop.f32.mrf.mxu0  ;;  %v3099_v22 = vpop.f32.mrf.mxu1 }
 0x1f1   : > { %1751 = vst.msk [vmem:[%s3782_s8 + $0x230] sm:$0xff] %vm1680_vm2, %v1247_v19  ;;  %1830 = vst.msk [vmem:[%s3782_s8 + $0x4a8] sm:$0xff] %vm1680_vm2, %v1642_v20 }
 0x1f2   : > { %v1251_v23 = vpop.f32.mrf.mxu0  ;;  %v1646_v24 = vpop.f32.mrf.mxu1 }
 0x1f3   : > { %v1252_v25 = vadd.f32 %v4261_v34, %v1251_v23  ;;  %v1647_v26 = vadd.f32 %v4261_v34, %v1646_v24 }
 0x1f4   : > { %v2865_v27 = vpop.f32.mrf.mxu0  ;;  %v3102_v28 = vpop.f32.mrf.mxu1 }
 0x1f5   : > { %1752 = vst.msk [vmem:[%s3782_s8 + $0x238] sm:$0xff] %vm1680_vm2, %v1252_v25  ;;  %1831 = vst.msk [vmem:[%s3782_s8 + $0x4b0] sm:$0xff] %vm1680_vm2, %v1647_v26 }
 0x1f6   : > { %v1256_v29 = vpop.f32.mrf.mxu0  ;;  %v1651_v30 = vpop.f32.mrf.mxu1 }
 0x1f7   : > { %v1257_v31 = vadd.f32 %v4261_v34, %v1256_v29  ;;  %v1652_v32 = vadd.f32 %v4261_v34, %v1651_v30 }
 0x1f8   : > { %v2868_v33 = vpop.f32.mrf.mxu0  ;;  %v3105_v1 = vpop.f32.mrf.mxu1 }
 0x1f9   : > { %1753 = vst.msk [vmem:[%s3782_s8 + $0x240] sm:$0xff] %vm1680_vm2, %v1257_v31  ;;  %1832 = vst.msk [vmem:[%s3782_s8 + $0x4b8] sm:$0xff] %vm1680_vm2, %v1652_v32 }
 0x1fa   : > { %v1261_v35 = vpop.f32.mrf.mxu0  ;;  %v1656_v38 = vpop.f32.mrf.mxu1 }
 0x1fb   : > { %v1262_v36 = vadd.f32 %v4261_v34, %v1261_v35  ;;  %v1657_v37 = vadd.f32 %v4261_v34, %v1656_v38 }
 0x1fc   : > { %v2871_v39 = vpop.f32.mrf.mxu0  ;;  %v3108_v40 = vpop.f32.mrf.mxu1 }
 0x1fd   : > { %1754 = vst.msk [vmem:[%s3782_s8 + $0x248] sm:$0xff] %vm1680_vm2, %v1262_v36  ;;  %1833 = vst.msk [vmem:[%s3782_s8 + $0x4c0] sm:$0xff] %vm1680_vm2, %v1657_v37 }
 0x1fe   : > { %v1266_v41 = vpop.f32.mrf.mxu0  ;;  %v1661_v42 = vpop.f32.mrf.mxu1 }
 0x1ff   : > { %v1267_v43 = vadd.f32 %v4261_v34, %v1266_v41  ;;  %v1662_v44 = vadd.f32 %v4261_v34, %v1661_v42 }
 0x200   : > { %v2874_v45 = vpop.f32.mrf.mxu0  ;;  %v3111_v46 = vpop.f32.mrf.mxu1 }
 0x201   : > { %1755 = vst.msk [vmem:[%s3782_s8 + $0x250] sm:$0xff] %vm1680_vm2, %v1267_v43  ;;  %1834 = vst.msk [vmem:[%s3782_s8 + $0x4c8] sm:$0xff] %vm1680_vm2, %v1662_v44 }
 0x202   : > { %v1271_v47 = vpop.f32.mrf.mxu0  ;;  %v1666_v48 = vpop.f32.mrf.mxu1 }
 0x203   : > { %v1272_v49 = vadd.f32 %v4261_v34, %v1271_v47  ;;  %v1667_v50 = vadd.f32 %v4261_v34, %v1666_v48 }
 0x204   : > { %v2877_v51 = vpop.f32.mrf.mxu0  ;;  %v3114_v52 = vpop.f32.mrf.mxu1 }
 0x205   : > { %1756 = vst.msk [vmem:[%s3782_s8 + $0x258] sm:$0xff] %vm1680_vm2, %v1272_v49  ;;  %1835 = vst.msk [vmem:[%s3782_s8 + $0x4d0] sm:$0xff] %vm1680_vm2, %v1667_v50 }
 0x206   : > { %v1276_v53 = vpop.f32.mrf.mxu0  ;;  %v1671_v54 = vpop.f32.mrf.mxu1 }
 0x207   : > { %v1277_v55 = vadd.f32 %v4261_v34, %v1276_v53  ;;  %v1672_v56 = vadd.f32 %v4261_v34, %v1671_v54 }
 0x208   : > { %v2880_v57 = vpop.f32.mrf.mxu0  ;;  %v3117_v58 = vpop.f32.mrf.mxu1 }
 0x209   : > { %1757 = vst.msk [vmem:[%s3782_s8 + $0x260] sm:$0xff] %vm1680_vm2, %v1277_v55  ;;  %1836 = vst.msk [vmem:[%s3782_s8 + $0x4d8] sm:$0xff] %vm1680_vm2, %v1672_v56 }
 0x20a   : > { %v1281_v59 = vpop.f32.mrf.mxu0  ;;  %v1676_v60 = vpop.f32.mrf.mxu1 }
 0x20b   : > { %v1282_v61 = vadd.f32 %v4261_v34, %v1281_v59  ;;  %v1677_v62 = vadd.f32 %v4261_v34, %v1676_v60 }
 0x20c   : > { %v2883_v63 = vpop.f32.mrf.mxu0  ;;  %v3120_v0 = vpop.f32.mrf.mxu1 }
 0x20d   : > { %1758 = vst.msk [vmem:[%s3782_s8 + $0x268] sm:$0xff] %vm1680_vm2, %v1282_v61  ;;  %1837 = vst.msk [vmem:[%s3782_s8 + $0x4e0] sm:$0xff] %vm1680_vm2, %v1677_v62  ;;  %1844 = sbr.rel (!%p3352_p4) target bundleno = 594 (0x252), region = 36 }
 0x20e   : > { %v1286_v2 = vpop.f32.mrf.mxu0 }
 0x20f   : > { %v1287_v3 = vadd.f32 %v4261_v34, %v1286_v2 }
 0x210   : > { %v2886_v4 = vpop.f32.mrf.mxu0 }
 0x211   : > { %1759 = vst.msk [vmem:[%s3782_s8 + $0x270] sm:$0xff] %vm1680_vm2, %v1287_v3 }
 0x212   : > { %s4708_s11 = smov (!%p1847_p8, %s1846_s11), 157 }
 0x213   : > { %s2469_s21 = sshll.u32 %s4708_s11, 7 }
 0x214   : > { %p2472_p9 = scmp.eq.s32.totalorder %s2469_s21, 0 }
 0x215   : > { %s4501_s22 = sshrl.u32 (!%p2472_p9), %s4708_s11, 6 }
 0x216   : > { %1855 = sbr.rel (%p2472_p9) target bundleno = 594 (0x252), region = 40  ;;  %p2473_p10 = scmp.le.s32.totalorder (!%p2472_p9), %s4501_s22, 0 }
 0x21b   : > { %2262 = sbr.rel (%p2473_p10) target bundleno = 577 (0x241), region = 116  ;;  %s4699_s15 = smov (!%p2473_p10), %s4495_s18 }
 0x21c   : > { %s4700_s20 = smov (!%p2473_p10), %s3782_s8  ;;  %s4510_s23 = smov (!%p2473_p10), 0  }
 0x21d   : > { %s4512_s24 = smov (!%p2473_p10), 0  }
 0x220 LB: >> { %v2044_v34 = vld [vmem:[%s3279_s20] sm:$0xff]  ;;  %v2046_v5 = vld [vmem:[%s3279_s20 + $0x8] sm:$0xff]  ;;  %v2048_v6 = vld [vmem:[%s3279_s20 + $0x10] sm:$0xff]  ;;  %s2172_s25 = sadd.s32 1, %s3283_s23  ;;  %s2038_s24 = sadd.s32 1, %s3287_s24   ;;  %s3287_s24 = sphi %s4512_s24, %s2038_s24   ;;  %s3283_s23 = sphi %s4510_s23, %s4703_s23   ;;  %s3279_s20 = sphi %s4700_s20, %s4702_s20   ;;  %s3275_s15 = sphi %s4699_s15, %s4701_s15  }
 0x221   : >> { %2045 = vst [vmem:[%s3275_s15] sm:$0xff] %v2044_v34  ;;  %2047 = vst [vmem:[%s3275_s15 + $0x8] sm:$0xff] %v2046_v5  ;;  %v2050_v7 = vld [vmem:[%s3279_s20 + $0x18] sm:$0xff]  ;;  %v2052_v8 = vld [vmem:[%s3279_s20 + $0x20] sm:$0xff]  ;;  %p2173_p11 = scmp.ge.s32.totalorder %s2172_s25, %s4501_s22  ;;  %p2037_p12 = scmp.ge.s32.totalorder %s2038_s24, %s4501_s22 }
 0x222   : >> { %2049 = vst [vmem:[%s3275_s15 + $0x10] sm:$0xff] %v2048_v6  ;;  %v2054_v9 = vld [vmem:[%s3279_s20 + $0x28] sm:$0xff]  ;;  %2051 = vst [vmem:[%s3275_s15 + $0x18] sm:$0xff] %v2050_v7  ;;  %v2056_v10 = vld [vmem:[%s3279_s20 + $0x30] sm:$0xff] }
 0x223   : >> { %2053 = vst [vmem:[%s3275_s15 + $0x20] sm:$0xff] %v2052_v8  ;;  %2055 = vst [vmem:[%s3275_s15 + $0x28] sm:$0xff] %v2054_v9  ;;  %v2058_v11 = vld [vmem:[%s3279_s20 + $0x38] sm:$0xff]  ;;  %v2060_v12 = vld [vmem:[%s3279_s20 + $0x40] sm:$0xff]  ;;  %s4710_s25 = smov (%p2173_p11, %s2172_s25), 0 }
 0x224   : >> { %2057 = vst [vmem:[%s3275_s15 + $0x30] sm:$0xff] %v2056_v10  ;;  %2059 = vst [vmem:[%s3275_s15 + $0x38] sm:$0xff] %v2058_v11  ;;  %v2062_v13 = vld [vmem:[%s3279_s20 + $0x48] sm:$0xff]  ;;  %v2064_v14 = vld [vmem:[%s3279_s20 + $0x50] sm:$0xff]  ;;  %s2474_s26 = sshll.u32 %s4710_s25, 9  ;;  %s4703_s23 = smov %s4710_s25 }
 0x225   : >> { %2061 = vst [vmem:[%s3275_s15 + $0x40] sm:$0xff] %v2060_v12  ;;  %v2066_v15 = vld [vmem:[%s3279_s20 + $0x58] sm:$0xff]  ;;  %2063 = vst [vmem:[%s3275_s15 + $0x48] sm:$0xff] %v2062_v13  ;;  %v2068_v16 = vld [vmem:[%s3279_s20 + $0x60] sm:$0xff]  ;;  %s4568_s27 = scalar_lea.vmem %s3782_s8, %s2474_s26 [#allocation2]   ;;  %s4571_s28 = scalar_lea.vmem %s4495_s18, %s2474_s26  }
 0x226   : >> { %2065 = vst [vmem:[%s3275_s15 + $0x50] sm:$0xff] %v2064_v14  ;;  %2067 = vst [vmem:[%s3275_s15 + $0x58] sm:$0xff] %v2066_v15  ;;  %v2070_v17 = vld [vmem:[%s3279_s20 + $0x68] sm:$0xff]  ;;  %v2072_v18 = vld [vmem:[%s3279_s20 + $0x70] sm:$0xff] }
 0x227   : >> { %2069 = vst [vmem:[%s3275_s15 + $0x60] sm:$0xff] %v2068_v16  ;;  %2071 = vst [vmem:[%s3275_s15 + $0x68] sm:$0xff] %v2070_v17  ;;  %v2074_v19 = vld [vmem:[%s3279_s20 + $0x78] sm:$0xff]  ;;  %v2076_v20 = vld [vmem:[%s3279_s20 + $0x80] sm:$0xff] }
 0x228   : >> { %2073 = vst [vmem:[%s3275_s15 + $0x70] sm:$0xff] %v2072_v18  ;;  %v2078_v21 = vld [vmem:[%s3279_s20 + $0x88] sm:$0xff]  ;;  %2075 = vst [vmem:[%s3275_s15 + $0x78] sm:$0xff] %v2074_v19  ;;  %v2080_v22 = vld [vmem:[%s3279_s20 + $0x90] sm:$0xff] }
 0x229   : >> { %2077 = vst [vmem:[%s3275_s15 + $0x80] sm:$0xff] %v2076_v20  ;;  %2079 = vst [vmem:[%s3275_s15 + $0x88] sm:$0xff] %v2078_v21  ;;  %v2082_v23 = vld [vmem:[%s3279_s20 + $0x98] sm:$0xff]  ;;  %v2084_v24 = vld [vmem:[%s3279_s20 + $0xa0] sm:$0xff] }
 0x22a   : >> { %2081 = vst [vmem:[%s3275_s15 + $0x90] sm:$0xff] %v2080_v22  ;;  %2083 = vst [vmem:[%s3275_s15 + $0x98] sm:$0xff] %v2082_v23  ;;  %v2086_v25 = vld [vmem:[%s3279_s20 + $0xa8] sm:$0xff]  ;;  %v2088_v26 = vld [vmem:[%s3279_s20 + $0xb0] sm:$0xff] }
 0x22b   : >> { %2085 = vst [vmem:[%s3275_s15 + $0xa0] sm:$0xff] %v2084_v24  ;;  %v2090_v27 = vld [vmem:[%s3279_s20 + $0xb8] sm:$0xff]  ;;  %2087 = vst [vmem:[%s3275_s15 + $0xa8] sm:$0xff] %v2086_v25  ;;  %v2092_v28 = vld [vmem:[%s3279_s20 + $0xc0] sm:$0xff] }
 0x22c   : >> { %2089 = vst [vmem:[%s3275_s15 + $0xb0] sm:$0xff] %v2088_v26  ;;  %2091 = vst [vmem:[%s3275_s15 + $0xb8] sm:$0xff] %v2090_v27  ;;  %v2094_v29 = vld [vmem:[%s3279_s20 + $0xc8] sm:$0xff]  ;;  %v2096_v30 = vld [vmem:[%s3279_s20 + $0xd0] sm:$0xff] }
 0x22d   : >> { %2093 = vst [vmem:[%s3275_s15 + $0xc0] sm:$0xff] %v2092_v28  ;;  %2095 = vst [vmem:[%s3275_s15 + $0xc8] sm:$0xff] %v2094_v29  ;;  %v2098_v31 = vld [vmem:[%s3279_s20 + $0xd8] sm:$0xff]  ;;  %v2100_v32 = vld [vmem:[%s3279_s20 + $0xe0] sm:$0xff] }
 0x22e   : >> { %2097 = vst [vmem:[%s3275_s15 + $0xd0] sm:$0xff] %v2096_v30  ;;  %v2102_v33 = vld [vmem:[%s3279_s20 + $0xe8] sm:$0xff]  ;;  %2099 = vst [vmem:[%s3275_s15 + $0xd8] sm:$0xff] %v2098_v31  ;;  %v2104_v1 = vld [vmem:[%s3279_s20 + $0xf0] sm:$0xff] }
 0x22f   : >> { %2101 = vst [vmem:[%s3275_s15 + $0xe0] sm:$0xff] %v2100_v32  ;;  %2103 = vst [vmem:[%s3275_s15 + $0xe8] sm:$0xff] %v2102_v33  ;;  %v2106_v35 = vld [vmem:[%s3279_s20 + $0xf8] sm:$0xff]  ;;  %v2108_v38 = vld [vmem:[%s3279_s20 + $0x100] sm:$0xff] }
 0x230   : >> { %2105 = vst [vmem:[%s3275_s15 + $0xf0] sm:$0xff] %v2104_v1  ;;  %2107 = vst [vmem:[%s3275_s15 + $0xf8] sm:$0xff] %v2106_v35  ;;  %v2110_v36 = vld [vmem:[%s3279_s20 + $0x108] sm:$0xff]  ;;  %v2112_v37 = vld [vmem:[%s3279_s20 + $0x110] sm:$0xff] }
 0x231   : >> { %2109 = vst [vmem:[%s3275_s15 + $0x100] sm:$0xff] %v2108_v38  ;;  %v2114_v39 = vld [vmem:[%s3279_s20 + $0x118] sm:$0xff]  ;;  %2111 = vst [vmem:[%s3275_s15 + $0x108] sm:$0xff] %v2110_v36  ;;  %v2116_v40 = vld [vmem:[%s3279_s20 + $0x120] sm:$0xff] }
 0x232   : >> { %2113 = vst [vmem:[%s3275_s15 + $0x110] sm:$0xff] %v2112_v37  ;;  %2115 = vst [vmem:[%s3275_s15 + $0x118] sm:$0xff] %v2114_v39  ;;  %v2118_v41 = vld [vmem:[%s3279_s20 + $0x128] sm:$0xff]  ;;  %v2120_v42 = vld [vmem:[%s3279_s20 + $0x130] sm:$0xff] }
 0x233   : >> { %2117 = vst [vmem:[%s3275_s15 + $0x120] sm:$0xff] %v2116_v40  ;;  %2119 = vst [vmem:[%s3275_s15 + $0x128] sm:$0xff] %v2118_v41  ;;  %v2122_v43 = vld [vmem:[%s3279_s20 + $0x138] sm:$0xff]  ;;  %v2124_v44 = vld [vmem:[%s3279_s20 + $0x140] sm:$0xff] }
 0x234   : >> { %2121 = vst [vmem:[%s3275_s15 + $0x130] sm:$0xff] %v2120_v42  ;;  %v2126_v45 = vld [vmem:[%s3279_s20 + $0x148] sm:$0xff]  ;;  %2123 = vst [vmem:[%s3275_s15 + $0x138] sm:$0xff] %v2122_v43  ;;  %v2128_v46 = vld [vmem:[%s3279_s20 + $0x150] sm:$0xff] }
 0x235   : >> { %2125 = vst [vmem:[%s3275_s15 + $0x140] sm:$0xff] %v2124_v44  ;;  %2127 = vst [vmem:[%s3275_s15 + $0x148] sm:$0xff] %v2126_v45  ;;  %v2130_v47 = vld [vmem:[%s3279_s20 + $0x158] sm:$0xff]  ;;  %v2132_v48 = vld [vmem:[%s3279_s20 + $0x160] sm:$0xff] }
 0x236   : >> { %2129 = vst [vmem:[%s3275_s15 + $0x150] sm:$0xff] %v2128_v46  ;;  %2131 = vst [vmem:[%s3275_s15 + $0x158] sm:$0xff] %v2130_v47  ;;  %v2134_v49 = vld [vmem:[%s3279_s20 + $0x168] sm:$0xff]  ;;  %v2136_v50 = vld [vmem:[%s3279_s20 + $0x170] sm:$0xff] }
 0x237   : >> { %2133 = vst [vmem:[%s3275_s15 + $0x160] sm:$0xff] %v2132_v48  ;;  %v2138_v51 = vld [vmem:[%s3279_s20 + $0x178] sm:$0xff]  ;;  %2135 = vst [vmem:[%s3275_s15 + $0x168] sm:$0xff] %v2134_v49  ;;  %v2140_v52 = vld [vmem:[%s3279_s20 + $0x180] sm:$0xff] }
 0x238   : >> { %2137 = vst [vmem:[%s3275_s15 + $0x170] sm:$0xff] %v2136_v50  ;;  %2139 = vst [vmem:[%s3275_s15 + $0x178] sm:$0xff] %v2138_v51  ;;  %v2142_v53 = vld [vmem:[%s3279_s20 + $0x188] sm:$0xff]  ;;  %v2144_v54 = vld [vmem:[%s3279_s20 + $0x190] sm:$0xff] }
 0x239   : >> { %2141 = vst [vmem:[%s3275_s15 + $0x180] sm:$0xff] %v2140_v52  ;;  %2143 = vst [vmem:[%s3275_s15 + $0x188] sm:$0xff] %v2142_v53  ;;  %v2146_v55 = vld [vmem:[%s3279_s20 + $0x198] sm:$0xff]  ;;  %v2148_v56 = vld [vmem:[%s3279_s20 + $0x1a0] sm:$0xff] }
 0x23a   : >> { %2145 = vst [vmem:[%s3275_s15 + $0x190] sm:$0xff] %v2144_v54  ;;  %v2150_v57 = vld [vmem:[%s3279_s20 + $0x1a8] sm:$0xff]  ;;  %2147 = vst [vmem:[%s3275_s15 + $0x198] sm:$0xff] %v2146_v55  ;;  %v2152_v58 = vld [vmem:[%s3279_s20 + $0x1b0] sm:$0xff] }
 0x23b   : >> { %2149 = vst [vmem:[%s3275_s15 + $0x1a0] sm:$0xff] %v2148_v56  ;;  %2151 = vst [vmem:[%s3275_s15 + $0x1a8] sm:$0xff] %v2150_v57  ;;  %v2154_v59 = vld [vmem:[%s3279_s20 + $0x1b8] sm:$0xff]  ;;  %v2156_v60 = vld [vmem:[%s3279_s20 + $0x1c0] sm:$0xff] }
 0x23c   : >> { %2153 = vst [vmem:[%s3275_s15 + $0x1b0] sm:$0xff] %v2152_v58  ;;  %2155 = vst [vmem:[%s3275_s15 + $0x1b8] sm:$0xff] %v2154_v59  ;;  %v2158_v61 = vld [vmem:[%s3279_s20 + $0x1c8] sm:$0xff]  ;;  %v2160_v62 = vld [vmem:[%s3279_s20 + $0x1d0] sm:$0xff]  ;;  %2040 = sbr.rel (!%p2037_p12) target bundleno = 544 (0x220), region = 122 }
 0x23d   : >> { %2157 = vst [vmem:[%s3275_s15 + $0x1c0] sm:$0xff] %v2156_v60  ;;  %v2162_v63 = vld [vmem:[%s3279_s20 + $0x1d8] sm:$0xff]  ;;  %2159 = vst [vmem:[%s3275_s15 + $0x1c8] sm:$0xff] %v2158_v61  ;;  %v2164_v0 = vld [vmem:[%s3279_s20 + $0x1e0] sm:$0xff] }
 0x23e   : >> { %2161 = vst [vmem:[%s3275_s15 + $0x1d0] sm:$0xff] %v2160_v62  ;;  %2163 = vst [vmem:[%s3275_s15 + $0x1d8] sm:$0xff] %v2162_v63  ;;  %v2166_v2 = vld [vmem:[%s3279_s20 + $0x1e8] sm:$0xff]  ;;  %v2168_v3 = vld [vmem:[%s3279_s20 + $0x1f0] sm:$0xff] }
 0x23f   : >> { %2165 = vst [vmem:[%s3275_s15 + $0x1e0] sm:$0xff] %v2164_v0  ;;  %2167 = vst [vmem:[%s3275_s15 + $0x1e8] sm:$0xff] %v2166_v2  ;;  %v2170_v4 = vld [vmem:[%s3279_s20 + $0x1f8] sm:$0xff]  ;;  %s4702_s20 = smov %s4568_s27 }
 0x240   : >> { %2169 = vst [vmem:[%s3275_s15 + $0x1f0] sm:$0xff] %v2168_v3  ;;  %2171 = vst [vmem:[%s3275_s15 + $0x1f8] sm:$0xff] %v2170_v4  ;;  %s4701_s15 = smov %s4571_s28 }
 0x241 PF: > { %s4676_s29 = sand.u32 63, %s4708_s11   ;;  %s2485_s30 = sshll.u32 %s4501_s22, 9 }
 0x242   : > { %s2183_s4 = scalar_lea.vmem %s3782_s8, %s2485_s30 [#allocation2]   ;;  %s2185_s5 = scalar_lea.vmem %s4495_s18, %s2485_s30  }
 0x243   : > { %p2479_p13 = scmp.le.s32.totalorder %s4676_s29, 0 }
 0x244   : > { %s3289_s6 = smov (!%p2479_p13), %s2185_s5   ;;  %s3293_s7 = smov (!%p2479_p13), %s2183_s4  }
 0x245   : > { %2276 = sbr.rel (%p2479_p13) target bundleno = 594 (0x252), region = 127  ;;  %s3297_s9 = smov (!%p2479_p13), 0  }
 0x246   : > { %s3301_s10 = smov (!%p2479_p13), 0  }
 0x24a LB: >> { %v2195_v34 = vld [vmem:[%s3295_s7] sm:$0xff]  ;;  %s2197_s11 = sadd.s32 1, %s3299_s9  ;;  %s2189_s10 = sadd.s32 1, %s3303_s10   ;;  %s3303_s10 = sphi %s3301_s10, %s2189_s10   ;;  %s3299_s9 = sphi %s3297_s9, %s3298_s9   ;;  %s3295_s7 = sphi %s3293_s7, %s2202_s7   ;;  %s3291_s6 = sphi %s3289_s6, %s2203_s6  }
 0x24b   : >> { %2196 = vst [vmem:[%s3291_s6] sm:$0xff] %v2195_v34  ;;  %p2198_p0 = scmp.ge.s32.totalorder %s2197_s11, %s4676_s29  ;;  %p2188_p1 = scmp.ge.s32.totalorder %s2189_s10, %s4676_s29 }
 0x24d   : >> { %s4712_s11 = smov (%p2198_p0, %s2197_s11), 0  ;;  %2191 = sbr.rel (!%p2188_p1) target bundleno = 586 (0x24a), region = 133 }
 0x24e   : >> { %s2480_s8 = sshll.u32 %s4712_s11, 3  ;;  %s3298_s9 = smov %s4712_s11  }
 0x24f   : >> { %s2202_s7 = scalar_lea.vmem %s2183_s4, %s2480_s8 [#allocation2]   ;;  %s2203_s6 = scalar_lea.vmem %s2185_s5, %s2480_s8  }
 0x252 PF: > { %p10_p2 = scmp.ge.s32.totalorder %s3342_s16, 4   ;;  %s4704_s12 = smov %s3267_s13 }
 0x253   : > { %s4705_s13 = smov %s3350_s19  ;;  %s4706_s14 = smov %s3342_s16 }
 0x254   :  { %12 = sbr.rel (!%p10_p2) target bundleno = 2 (0x2), region = 144 }

</bundles_post_ra>
